<compile_context>
chip_gen: v5e
topology: v5e:2x2
jax: 0.10.0
libtpu: 0.0.40
codegen_flags: <defaults>
</compile_context>

<pallas_src>
from functools import partial

import jax
import jax.numpy as jnp
from jax.experimental import pallas as pl
from jax.experimental.pallas import tpu as pltpu


# --------------------------------------------------------------------------
# Kernel A: fused q/k/v projection + width attention + to_out conv1
#           + BatchNorm partial statistics, for R rows of (b*h) per grid step.
# --------------------------------------------------------------------------
def _attn_conv1_kernel(xl_ref, xr_ref, wq_ref, wkv_ref, w1a_ref, w1b_ref,
                       y1_ref, psum_ref, psq_ref, *, scale, inner):
    R, W, C = xl_ref.shape
    xl = xl_ref[...].reshape(R * W, C)
    xr = xr_ref[...].reshape(R * W, C)

    q = jnp.dot(xl, wq_ref[...], preferred_element_type=jnp.float32)      # (R*W, inner)
    kv = jnp.dot(xr, wkv_ref[...], preferred_element_type=jnp.float32)    # (R*W, 2*inner)
    k = kv[:, :inner]
    v = kv[:, inner:]

    q3 = q.reshape(R, W, inner)
    k3 = k.reshape(R, W, inner)
    v3 = v.reshape(R, W, inner)

    dots = jnp.einsum("rwi,rvi->rwv", q3, k3,
                      preferred_element_type=jnp.float32) * scale          # (R, W, W)
    dots = dots - jnp.max(dots, axis=-1, keepdims=True)
    e = jnp.exp(dots)
    attn = e / jnp.sum(e, axis=-1, keepdims=True)
    a = jnp.einsum("rwv,rvi->rwi", attn, v3,
                   preferred_element_type=jnp.float32)                     # (R, W, inner)
    a2 = a.reshape(R * W, inner)

    # to_out conv1 on concat([left, attn_out]) expressed as two matmuls.
    y1 = (jnp.dot(xl, w1a_ref[...], preferred_element_type=jnp.float32)
          + jnp.dot(a2, w1b_ref[...], preferred_element_type=jnp.float32))  # (R*W, out_dim)

    y1_ref[...] = y1
    psum_ref[...] = jnp.sum(y1, axis=0, keepdims=True)[None]                # (1, 1, out_dim)
    psq_ref[...] = jnp.sum(y1 * y1, axis=0, keepdims=True)[None]


# --------------------------------------------------------------------------
# Kernel B: BatchNorm (folded scale/shift) + LeakyReLU(0.2) + to_out conv2,
#           emitted channel-major so the stored minor dim is lane-dense (TN >= 128).
# --------------------------------------------------------------------------
def _bn_lrelu_conv2t_kernel(y1_ref, sc_ref, sh_ref, w2t_ref, o_ref):
    y = y1_ref[...] * sc_ref[...] + sh_ref[...]          # (TN, out_dim)
    y = jnp.where(y >= 0.0, y, 0.2 * y)
    # y2^T = W2^T @ y^T  ->  (out_dim, TN); lane-dense store.
    o_ref[...] = jnp.dot(w2t_ref[...], y.T, preferred_element_type=jnp.float32)


# --------------------------------------------------------------------------
# Tiling helpers
# --------------------------------------------------------------------------
def _pick_row_tile(BH, W):
    """Rows of (b*h) per attention grid step: aim for ~256-512 query rows per
    step while keeping >= 2 grid blocks (dual-TensorCore on v7x)."""
    target = max(1, 512 // max(W, 1))
    best = 1
    for r in range(1, BH + 1):
        if BH % r:
            continue
        if r > target:
            break
        if BH // r >= 2 or (BH == 1 and r == 1):
            best = r
    return best


def _pick_lane_tile(Np, cap=1024):
    """Lane-tile for the final channel-major output: multiple of 128 dividing Np,
    grown toward `cap` while keeping >= 2 grid blocks."""
    tn = 128
    while tn * 2 <= cap and Np % (tn * 2) == 0 and Np // (tn * 2) >= 2:
        tn *= 2
    return tn


# --------------------------------------------------------------------------
# Wrapper
# --------------------------------------------------------------------------
def sttm_single_forward(left_feat, right_feat, params, *, heads, dim_head):
    B, C, H, W = left_feat.shape
    inner = heads * dim_head
    out_dim = params["w2"].shape[1]
    scale = dim_head ** (-0.5)

    left_nhwc = jnp.transpose(left_feat, (0, 2, 3, 1)).astype(jnp.float32)   # (B, H, W, C)
    right_nhwc = jnp.transpose(right_feat, (0, 2, 3, 1)).astype(jnp.float32)
    BH = B * H
    xl = left_nhwc.reshape(BH, W, C)
    xr = right_nhwc.reshape(BH, W, C)

    wkv = jnp.concatenate([params["wk"], params["wv"]], axis=1)   # (C, 2*inner) fused k/v
    w1a = params["w1"][:C]                                        # rows for left channels
    w1b = params["w1"][C:]                                        # rows for attention output

    R = _pick_row_tile(BH, W)
    num_a = BH // R
    RW = R * W
    N = BH * W

    cparams = pltpu.CompilerParams(
        dimension_semantics=("parallel",),
        vmem_limit_bytes=32 * 1024 * 1024,   # explicit, safe on v7x's smaller VMEM
    )

    # ---- Kernel A: attention + conv1 + BN partial sums ------------------
    y1, psum, psq = pl.pallas_call(
        partial(_attn_conv1_kernel, scale=scale, inner=inner),
        out_shape=(
            jax.ShapeDtypeStruct((N, out_dim), jnp.float32),
            jax.ShapeDtypeStruct((num_a, 1, out_dim), jnp.float32),
            jax.ShapeDtypeStruct((num_a, 1, out_dim), jnp.float32),
        ),
        grid=(num_a,),
        in_specs=[
            pl.BlockSpec((R, W, C), lambda i: (i, 0, 0)),
            pl.BlockSpec((R, W, C), lambda i: (i, 0, 0)),
            pl.BlockSpec((C, inner), lambda i: (0, 0)),
            pl.BlockSpec((C, 2 * inner), lambda i: (0, 0)),
            pl.BlockSpec((C, out_dim), lambda i: (0, 0)),
            pl.BlockSpec((inner, out_dim), lambda i: (0, 0)),
        ],
        out_specs=(
            pl.BlockSpec((RW, out_dim), lambda i: (i, 0)),
            pl.BlockSpec((1, 1, out_dim), lambda i: (i, 0, 0)),
            pl.BlockSpec((1, 1, out_dim), lambda i: (i, 0, 0)),
        ),
        compiler_params=cparams,
    )(xl, xr, params["wq"], wkv, w1a, w1b)

    # ---- Finish BatchNorm statistics (tiny (out_dim,) reduction in XLA) --
    eps = 1e-5
    n = jnp.float32(N)
    mean = jnp.sum(psum[:, 0, :], axis=0) / n
    var = jnp.maximum(jnp.sum(psq[:, 0, :], axis=0) / n - mean * mean, 0.0)  # biased
    inv = jax.lax.rsqrt(var + eps)
    bn_scale = (params["bn_gamma"] * inv)[None, :]                           # (1, out_dim)
    bn_shift = (params["bn_beta"] - params["bn_gamma"] * mean * inv)[None, :]

    # ---- Kernel B: BN apply + LeakyReLU + conv2, channel-major output ----
    Np = ((N + 127) // 128) * 128
    y1p = y1 if Np == N else jnp.pad(y1, ((0, Np - N), (0, 0)))
    TN = _pick_lane_tile(Np)

    y2t = pl.pallas_call(
        _bn_lrelu_conv2t_kernel,
        out_shape=jax.ShapeDtypeStruct((out_dim, Np), jnp.float32),
        grid=(Np // TN,),
        in_specs=[
            pl.BlockSpec((TN, out_dim), lambda i: (i, 0)),
            pl.BlockSpec((1, out_dim), lambda i: (0, 0)),
            pl.BlockSpec((1, out_dim), lambda i: (0, 0)),
            pl.BlockSpec((out_dim, out_dim), lambda i: (0, 0)),
        ],
        out_specs=pl.BlockSpec((out_dim, TN), lambda i: (0, i)),
        compiler_params=cparams,
    )(y1p, bn_scale, bn_shift, params["w2"].T)

    out = y2t[:, :N].reshape(out_dim, B, H, W)     # channel-major -> NCHW
    return jnp.transpose(out, (1, 0, 2, 3))


# --------------------------------------------------------------------------
# Pure-JAX reference (mirrors the PyTorch forward op-by-op) for validation.
# --------------------------------------------------------------------------
def reference_forward(left_feat, right_feat, params, *, heads, dim_head):
    B, C, H, W = left_feat.shape
    inner = heads * dim_head
    scale = dim_head ** (-0.5)

    def conv1x1(x, w):  # x: NCHW, w: (Cin, Cout)
        return jnp.einsum("bchw,cd->bdhw", x, w)

    q = conv1x1(left_feat, params["wq"])
    k = conv1x1(right_feat, params["wk"])
    v = conv1x1(right_feat, params["wv"])
    qp = jnp.transpose(q, (0, 2, 3, 1)).reshape(B * H, W, inner)
    kp = jnp.transpose(k, (0, 2, 3, 1)).reshape(B * H, W, inner)
    vp = jnp.transpose(v, (0, 2, 3, 1)).reshape(B * H, W, inner)
    dots = jnp.einsum("nwc,nvc->nwv", qp, kp) * scale
    attn = jax.nn.softmax(dots, axis=-1)
    out = jnp.einsum("nwv,nvc->nwc", attn, vp)
    out = jnp.transpose(out.reshape(B, H, W, inner), (0, 3, 1, 2))
    new_left = jnp.concatenate([left_feat, out], axis=1)

    y1 = conv1x1(new_left, params["w1"])
    mean = jnp.mean(y1, axis=(0, 2, 3))
    var = jnp.mean(jnp.square(y1 - mean[None, :, None, None]), axis=(0, 2, 3))
    yb = (y1 - mean[None, :, None, None]) * jax.lax.rsqrt(var + 1e-5)[None, :, None, None]
    yb = yb * params["bn_gamma"][None, :, None, None] + params["bn_beta"][None, :, None, None]
    yl = jnp.where(yb >= 0.0, yb, 0.2 * yb)
    return conv1x1(yl, params["w2"])


# --------------------------------------------------------------------------
if __name__ == "__main__":
    # Small shapes consistent with the module. dim must equal inner_dim for the
    # channel concat to match Conv2d(inner_dim*2, out_dim), as in the original.
    heads, dim_head = 2, 8
    dim = heads * dim_head          # 16
    inner = heads * dim_head        # 16
    out_dim = 32
    B, H, W = 2, 16, 16

    key = jax.random.PRNGKey(0)
    ks = jax.random.split(key, 8)
    params = {
        "wq": jax.random.normal(ks[0], (dim, inner), jnp.float32) * 0.05,
        "wk": jax.random.normal(ks[1], (dim, inner), jnp.float32) * 0.05,
        "wv": jax.random.normal(ks[2], (dim, inner), jnp.float32) * 0.05,
        "w1": jax.random.normal(ks[3], (dim + inner, out_dim), jnp.float32) * 0.05,
        "w2": jax.random.normal(ks[4], (out_dim, out_dim), jnp.float32) * 0.05,
        "bn_gamma": jnp.ones((out_dim,), jnp.float32),
        "bn_beta": jnp.zeros((out_dim,), jnp.float32),
    }

    left_feat = jax.random.normal(ks[5], (B, dim, H, W), jnp.float32)
    right_feat = jax.random.normal(ks[6], (B, dim, H, W), jnp.float32)

    out = sttm_single_forward(left_feat, right_feat, params, heads=heads, dim_head=dim_head)
    out = jax.block_until_ready(out)

    ref = reference_forward(left_feat, right_feat, params, heads=heads, dim_head=dim_head)
    ref = jax.block_until_ready(ref)

    assert out.shape == (B, out_dim, H, W), out.shape
    max_err = float(jnp.max(jnp.abs(out - ref)))
    assert max_err < 5e-3, f"max abs error too large: {max_err}"

    print("KERNEL_OK")
</pallas_src>

<mosaic_0001>
module attributes {stable_mosaic.version = 11 : i64} {
  func.func @_attn_conv1_kernel(%arg0: i32, %arg1: memref<16x16x16xf32, #tpu.memory_space<vmem>>, %arg2: memref<16x16x16xf32, #tpu.memory_space<vmem>>, %arg3: memref<16x16xf32, #tpu.memory_space<vmem>>, %arg4: memref<16x32xf32, #tpu.memory_space<vmem>>, %arg5: memref<16x32xf32, #tpu.memory_space<vmem>>, %arg6: memref<16x32xf32, #tpu.memory_space<vmem>>, %arg7: memref<256x32xf32, #tpu.memory_space<vmem>>, %arg8: memref<1x1x32xf32, #tpu.memory_space<vmem>>, %arg9: memref<1x1x32xf32, #tpu.memory_space<vmem>>) attributes {dimension_semantics = [#tpu.dimension_semantics<parallel>], iteration_bounds = array<i64: 2>, scalar_prefetch = 0 : i64, scratch_operands = 0 : i64, tpu.core_type = #tpu.core_type<tc>, window_params = [{transform_indices = @transform_0, window_bounds = array<i64: 16, 16, 16>}, {transform_indices = @transform_1, window_bounds = array<i64: 16, 16, 16>}, {pipeline_mode = #tpu.pipeline_mode<synchronous>, transform_indices = @transform_2, window_bounds = array<i64: 16, 16>}, {pipeline_mode = #tpu.pipeline_mode<synchronous>, transform_indices = @transform_3, window_bounds = array<i64: 16, 32>}, {pipeline_mode = #tpu.pipeline_mode<synchronous>, transform_indices = @transform_4, window_bounds = array<i64: 16, 32>}, {pipeline_mode = #tpu.pipeline_mode<synchronous>, transform_indices = @transform_5, window_bounds = array<i64: 16, 32>}, {transform_indices = @transform_6, window_bounds = array<i64: 256, 32>}, {transform_indices = @transform_7, window_bounds = array<i64: 1, 1, 32>}, {transform_indices = @transform_8, window_bounds = array<i64: 1, 1, 32>}]} {
    %c0 = arith.constant 0 : index
    %c0_0 = arith.constant 0 : index
    %c0_1 = arith.constant 0 : index
    %0 = vector.load %arg1[%c0, %c0_0, %c0_1] : memref<16x16x16xf32, #tpu.memory_space<vmem>>, vector<16x16x16xf32>
    %1 = vector.shape_cast %0 : vector<16x16x16xf32> to vector<256x16xf32>
    %c0_2 = arith.constant 0 : index
    %c0_3 = arith.constant 0 : index
    %c0_4 = arith.constant 0 : index
    %2 = vector.load %arg2[%c0_2, %c0_3, %c0_4] : memref<16x16x16xf32, #tpu.memory_space<vmem>>, vector<16x16x16xf32>
    %3 = vector.shape_cast %2 : vector<16x16x16xf32> to vector<256x16xf32>
    %c0_5 = arith.constant 0 : index
    %c0_6 = arith.constant 0 : index
    %4 = vector.load %arg3[%c0_5, %c0_6] : memref<16x16xf32, #tpu.memory_space<vmem>>, vector<16x16xf32>
    %cst = arith.constant dense<0.000000e+00> : vector<256x16xf32>
    %5 = tpu.matmul %1, %4, %cst {dimension_numbers = #tpu.dot_dimension_numbers<[1], [0], [0], [1], [0, 0, 1, 1], [], []>} : vector<256x16xf32>, vector<16x16xf32>, vector<256x16xf32> -> vector<256x16xf32>
    %c0_7 = arith.constant 0 : index
    %c0_8 = arith.constant 0 : index
    %6 = vector.load %arg4[%c0_7, %c0_8] : memref<16x32xf32, #tpu.memory_space<vmem>>, vector<16x32xf32>
    %cst_9 = arith.constant dense<0.000000e+00> : vector<256x32xf32>
    %7 = tpu.matmul %3, %6, %cst_9 {dimension_numbers = #tpu.dot_dimension_numbers<[1], [0], [0], [1], [0, 0, 1, 1], [], []>} : vector<256x16xf32>, vector<16x32xf32>, vector<256x32xf32> -> vector<256x32xf32>
    %8 = vector.extract_strided_slice %7 {offsets = [0, 0], sizes = [256, 16], strides = [1, 1]} : vector<256x32xf32> to vector<256x16xf32>
    %9 = vector.extract_strided_slice %7 {offsets = [0, 16], sizes = [256, 16], strides = [1, 1]} : vector<256x32xf32> to vector<256x16xf32>
    %10 = vector.shape_cast %5 : vector<256x16xf32> to vector<16x16x16xf32>
    %11 = vector.shape_cast %8 : vector<256x16xf32> to vector<16x16x16xf32>
    %12 = vector.shape_cast %9 : vector<256x16xf32> to vector<16x16x16xf32>
    "tpu.trace_start"() <{level = 10 : i32, message = "rwi,rvi->rwv"}> : () -> ()
    %cst_10 = arith.constant dense<0.000000e+00> : vector<16x16x16xf32>
    %13 = tpu.matmul %10, %11, %cst_10 {dimension_numbers = #tpu.dot_dimension_numbers<[2], [2], [1], [1], [0, 0, 0, 1, 1, 1], [0], [0]>} : vector<16x16x16xf32>, vector<16x16x16xf32>, vector<16x16x16xf32> -> vector<16x16x16xf32>
    "tpu.trace_stop"() : () -> ()
    %cst_11 = arith.constant 0.353553385 : f32
    %14 = vector.broadcast %cst_11 : f32 to vector<16x16x16xf32>
    %15 = arith.mulf %13, %14 : vector<16x16x16xf32>
    %cst_12 = arith.constant dense<0xFF800000> : vector<16x16xf32>
    %16 = vector.multi_reduction <maximumf>, %15, %cst_12 [2] : vector<16x16x16xf32> to vector<16x16xf32>
    %17 = vector.shape_cast %16 : vector<16x16xf32> to vector<16x16x1xf32>
    %18 = vector.broadcast %17 : vector<16x16x1xf32> to vector<16x16x16xf32>
    %19 = arith.subf %15, %18 : vector<16x16x16xf32>
    %20 = math.exp %19 : vector<16x16x16xf32>
    %cst_13 = arith.constant dense<0.000000e+00> : vector<16x16xf32>
    %21 = vector.multi_reduction <add>, %20, %cst_13 [2] : vector<16x16x16xf32> to vector<16x16xf32>
    %22 = vector.shape_cast %21 : vector<16x16xf32> to vector<16x16x1xf32>
    %23 = vector.broadcast %22 : vector<16x16x1xf32> to vector<16x16x16xf32>
    %24 = arith.divf %20, %23 : vector<16x16x16xf32>
    "tpu.trace_start"() <{level = 10 : i32, message = "rwv,rvi->rwi"}> : () -> ()
    %cst_14 = arith.constant dense<0.000000e+00> : vector<16x16x16xf32>
    %25 = tpu.matmul %24, %12, %cst_14 {dimension_numbers = #tpu.dot_dimension_numbers<[2], [1], [1], [2], [0, 0, 0, 1, 1, 2], [0], [0]>} : vector<16x16x16xf32>, vector<16x16x16xf32>, vector<16x16x16xf32> -> vector<16x16x16xf32>
    "tpu.trace_stop"() : () -> ()
    %26 = vector.shape_cast %25 : vector<16x16x16xf32> to vector<256x16xf32>
    %c0_15 = arith.constant 0 : index
    %c0_16 = arith.constant 0 : index
    %27 = vector.load %arg5[%c0_15, %c0_16] : memref<16x32xf32, #tpu.memory_space<vmem>>, vector<16x32xf32>
    %cst_17 = arith.constant dense<0.000000e+00> : vector<256x32xf32>
    %28 = tpu.matmul %1, %27, %cst_17 {dimension_numbers = #tpu.dot_dimension_numbers<[1], [0], [0], [1], [0, 0, 1, 1], [], []>} : vector<256x16xf32>, vector<16x32xf32>, vector<256x32xf32> -> vector<256x32xf32>
    %c0_18 = arith.constant 0 : index
    %c0_19 = arith.constant 0 : index
    %29 = vector.load %arg6[%c0_18, %c0_19] : memref<16x32xf32, #tpu.memory_space<vmem>>, vector<16x32xf32>
    %cst_20 = arith.constant dense<0.000000e+00> : vector<256x32xf32>
    %30 = tpu.matmul %26, %29, %cst_20 {dimension_numbers = #tpu.dot_dimension_numbers<[1], [0], [0], [1], [0, 0, 1, 1], [], []>} : vector<256x16xf32>, vector<16x32xf32>, vector<256x32xf32> -> vector<256x32xf32>
    %31 = arith.addf %28, %30 : vector<256x32xf32>
    %c0_21 = arith.constant 0 : index
    %c0_22 = arith.constant 0 : index
    %32 = vector.load %arg7[%c0_21, %c0_22] : memref<256x32xf32, #tpu.memory_space<vmem>>, vector<256x32xf32>
    tpu.vector_store %arg7[%c0_21, %c0_22], %31 {strides = array<i32>} : memref<256x32xf32, #tpu.memory_space<vmem>>, vector<256x32xf32>,
    %cst_23 = arith.constant dense<0.000000e+00> : vector<32xf32>
    %33 = vector.multi_reduction <add>, %31, %cst_23 [0] : vector<256x32xf32> to vector<32xf32>
    %34 = vector.shape_cast %33 : vector<32xf32> to vector<1x32xf32>
    %35 = vector.shape_cast %34 : vector<1x32xf32> to vector<1x1x32xf32>
    %c0_24 = arith.constant 0 : index
    %c0_25 = arith.constant 0 : index
    %c0_26 = arith.constant 0 : index
    %36 = vector.load %arg8[%c0_24, %c0_25, %c0_26] : memref<1x1x32xf32, #tpu.memory_space<vmem>>, vector<1x1x32xf32>
    tpu.vector_store %arg8[%c0_24, %c0_25, %c0_26], %35 {strides = array<i32>} : memref<1x1x32xf32, #tpu.memory_space<vmem>>, vector<1x1x32xf32>,
    %37 = arith.mulf %31, %31 : vector<256x32xf32>
    %cst_27 = arith.constant dense<0.000000e+00> : vector<32xf32>
    %38 = vector.multi_reduction <add>, %37, %cst_27 [0] : vector<256x32xf32> to vector<32xf32>
    %39 = vector.shape_cast %38 : vector<32xf32> to vector<1x32xf32>
    %40 = vector.shape_cast %39 : vector<1x32xf32> to vector<1x1x32xf32>
    %c0_28 = arith.constant 0 : index
    %c0_29 = arith.constant 0 : index
    %c0_30 = arith.constant 0 : index
    %41 = vector.load %arg9[%c0_28, %c0_29, %c0_30] : memref<1x1x32xf32, #tpu.memory_space<vmem>>, vector<1x1x32xf32>
    tpu.vector_store %arg9[%c0_28, %c0_29, %c0_30], %40 {strides = array<i32>} : memref<1x1x32xf32, #tpu.memory_space<vmem>>, vector<1x1x32xf32>,
    return
  }
  func.func @transform_0(%arg0: i32) -> (i32, i32, i32) {
    %c0_i32 = arith.constant 0 : i32
    %c0_i32_0 = arith.constant 0 : i32
    %c0_i32_1 = arith.constant 0 : i32
    return %arg0, %c0_i32, %c0_i32_0 : i32, i32, i32
  }
  func.func @transform_1(%arg0: i32) -> (i32, i32, i32) {
    %c0_i32 = arith.constant 0 : i32
    %c0_i32_0 = arith.constant 0 : i32
    %c0_i32_1 = arith.constant 0 : i32
    return %arg0, %c0_i32, %c0_i32_0 : i32, i32, i32
  }
  func.func @transform_2(%arg0: i32) -> (i32, i32) {
    %c0_i32 = arith.constant 0 : i32
    %c0_i32_0 = arith.constant 0 : i32
    %c0_i32_1 = arith.constant 0 : i32
    return %c0_i32, %c0_i32_0 : i32, i32
  }
  func.func @transform_3(%arg0: i32) -> (i32, i32) {
    %c0_i32 = arith.constant 0 : i32
    %c0_i32_0 = arith.constant 0 : i32
    %c0_i32_1 = arith.constant 0 : i32
    return %c0_i32, %c0_i32_0 : i32, i32
  }
  func.func @transform_4(%arg0: i32) -> (i32, i32) {
    %c0_i32 = arith.constant 0 : i32
    %c0_i32_0 = arith.constant 0 : i32
    %c0_i32_1 = arith.constant 0 : i32
    return %c0_i32, %c0_i32_0 : i32, i32
  }
  func.func @transform_5(%arg0: i32) -> (i32, i32) {
    %c0_i32 = arith.constant 0 : i32
    %c0_i32_0 = arith.constant 0 : i32
    %c0_i32_1 = arith.constant 0 : i32
    return %c0_i32, %c0_i32_0 : i32, i32
  }
  func.func @transform_6(%arg0: i32) -> (i32, i32) {
    %c0_i32 = arith.constant 0 : i32
    %c0_i32_0 = arith.constant 0 : i32
    return %arg0, %c0_i32 : i32, i32
  }
  func.func @transform_7(%arg0: i32) -> (i32, i32, i32) {
    %c0_i32 = arith.constant 0 : i32
    %c0_i32_0 = arith.constant 0 : i32
    %c0_i32_1 = arith.constant 0 : i32
    return %arg0, %c0_i32, %c0_i32_0 : i32, i32, i32
  }
  func.func @transform_8(%arg0: i32) -> (i32, i32, i32) {
    %c0_i32 = arith.constant 0 : i32
    %c0_i32_0 = arith.constant 0 : i32
    %c0_i32_1 = arith.constant 0 : i32
    return %arg0, %c0_i32, %c0_i32_0 : i32, i32, i32
  }
}

</mosaic_0001>

<bundles_post_ra>
// kernel: tpu_custom_call.1
= control target key start
LH: loop header
LB: loop body
LE: loop exit
PB: predicated region body
PF: predicated region fallthrough
CT: control target
= control target key end

     0   :  { %s5465_s0 = inlined_call_operand.vmem [shape: f32[32,16,16], index: 0, kind: input, shape index: {}]   ;;  %s5466_s1 = inlined_call_operand.vmem [shape: f32[32,16,16], index: 1, kind: input, shape index: {}]   ;;  %s5467_s2 = inlined_call_operand.vmem [shape: f32[16,16], index: 2, kind: input, shape index: {}]   ;;  %s5468_s3 = inlined_call_operand.vmem [shape: f32[16,32], index: 3, kind: input, shape index: {}]   ;;  %s5469_s4 = inlined_call_operand.vmem [shape: f32[16,32], index: 4, kind: input, shape index: {}]   ;;  %s5470_s5 = inlined_call_operand.vmem [shape: f32[16,32], index: 5, kind: input, shape index: {}]   ;;  %s5471_s6 = inlined_call_operand.vmem [shape: f32[512,32], index: 6, kind: output, shape index: {0}]   ;;  %s5472_s7 = inlined_call_operand.hbm [shape: f32[2,1,32], index: 7, kind: output, shape index: {1}]   ;;  %s5473_s8 = inlined_call_operand.hbm [shape: f32[2,1,32], index: 8, kind: output, shape index: {2}]  }
   0x1   :  { %5478 = sst [smem:[#allocation12_spill]] %s5465_s0 }
   0x2   :  { %14 = vsyncpa [#allocation3], 0 }
   0x3   :  { %16 = vsyncpa [#allocation3 + $0x1], 0 }
   0x4   :  { %17 = vsyncpa [#allocation5], 0 }
   0x5   :  { %19 = vsyncpa [#allocation5 + $0x1], 0  ;;  %s4125_s27 = smov 0   ;;  %s4127_s28 = smov 0  }
   0x6   :  { %s4129_s29 = smov 0   ;;  %s4131_s30 = smov 0  }
   0x7 LB: > { %s4146_s9 = sadd.s32 4294967295, %s4077_s30   ;;  %s3454_s10 = sadd.s32 4294967294, %s4077_s30   ;;  %s4077_s30 = sphi %s4131_s30, %s5513_s30   ;;  %s4073_s29 = sphi %s4129_s29, %s5512_s29   ;;  %s4069_s28 = sphi %s4127_s28, %s5511_s28   ;;  %s4065_s27 = sphi %s4125_s27, %s5510_s27  }
   0x8   : > { %s4150_s11 = sadd.s32 1, %s4077_s30   ;;  %s194_s12 = sadd.s32 1, %s4073_s29 }
   0x9   : > { %s191_s13 = ssub.s32 %s4077_s30, %s4150_s11  ;;  %p204_p0 = scmp.ne.s32.totalorder %s4073_s29, %s4069_s28 }
   0xa   : > { %p192_p1 = scmp.eq.s32.totalorder %s191_s13, 0  ;;  %p205_p2 = scmp.eq.s32.totalorder %s4146_s9, 1 }
   0xb   : > { %p210_p3 = scmp.ne.s32.totalorder %s4069_s28, %s4065_s27  ;;  %p211_p4 = scmp.eq.s32.totalorder %s3454_s10, 1 }
   0xc   : > { %s4161_s14 = scalar_select %p192_p1, %s4073_s29, %s194_s12  }
   0xd   : > { %p4163_p5 = por %p205_p2, %p204_p0  ;;  %p4167_p6 = por %p211_p4, %p210_p3 }
   0xe   : > { %p3457_p7 = scmp.ge.s32.totalorder %s4077_s30, 1  ;;  %p287_p8 = scmp.lt.s32.totalorder %s4077_s30, 3 }
  0x10   : > { %p288_p9 = pnand %p3457_p7, %p287_p8 }
  0x12   : > { %291 = sbr.rel (%p288_p9) target bundleno = 1199 (0x4af), region = 44 }
  0x17   : > { %v633_v0 = vld [vmem:[%s5468_s3 + $0x8] sm:$0xff]  ;;  %v632_v1 = vld [vmem:[%s5468_s3] sm:$0xff]  ;;  %s3458_s21 = sshll.u32 %s4146_s9, 4  ;;  %vm422_vm0 = vcmask 130048   ;;  %s5481_s0 = sld [smem:[#allocation12_spill]] }
  0x18   : > { %v421_v2 = vld [vmem:[%s5467_s2 + $0x8] sm:$0xff]  ;;  %744 = vmatpush.msra.mxu1 %v633_v0  ;;  %p337_p10 = scmp.lt.s32.totalorder %s3458_s21, 31  ;;  %v420_v3 = vld [vmem:[%s5467_s2] sm:$0xff]  ;;  %3696 = vmatpush.msra.mxu3 %v633_v0  ;;  %s4079_s20 = smov 112  }
  0x19   : > { %3694 = vmatpush.msra.mxu2 %v421_v2  ;;  %533 = vmatpush.msra.mxu0 %v421_v2  ;;  %s3317_s24 = scalar_lea.hbm %s5472_s7, %s4146_s9  ;;  %s3330_s10 = scalar_lea.hbm %s5473_s8, %s4146_s9 }
  0x1a   : > { %745 = vmatpush.msra.mxu1 %v632_v1  ;;  %s5515_s21 = smov (!%p337_p10, %s3458_s21), 31  ;;  %3697 = vmatpush.msra.mxu3 %v632_v1 }
  0x1b   : > { %3695 = vmatpush.msra.mxu2 %v420_v3  ;;  %534 = vmatpush.msra.mxu0 %v420_v3  ;;  %s3692_s26 = sshll.u32 %s5515_s21, 4 }
  0x1c   : > { %s4189_s13 = scalar_lea.vmem %s5466_s1, %s3692_s26 }
  0x1d   : > { %s4194_s19 = scalar_lea.vmem %s5481_s0, %s3692_s26  ;;  %v388_v4 = vld [vmem:[%s4189_s13] sm:$0xff]  ;;  %v389_v8 = vld [vmem:[%s4189_s13 + $0x8] sm:$0xff]  ;;  %v390_v12 = vld [vmem:[%s4189_s13 + $0x10] sm:$0xff]  ;;  %s4003_s26 = scalar_lea.hbm %s5472_s7, 2 }
  0x1e   : > { %v372_v5 = vld [vmem:[%s4194_s19 + $0x80] sm:$0xff]  ;;  %3498 = vmatmul.msk.f32.vlgmr.msra.gmra.mxu1 %vm422_vm0, %v388_v4  ;;  %v373_v9 = vld [vmem:[%s4194_s19 + $0x88] sm:$0xff]  ;;  %v374_v13 = vld [vmem:[%s4194_s19 + $0x90] sm:$0xff] }
  0x1f   : > { %3482 = vmatmul.msk.f32.vlgmr.msra.gmra.mxu2 %vm422_vm0, %v372_v5  ;;  %v356_v6 = vld [vmem:[%s4194_s19] sm:$0xff]  ;;  %v357_v10 = vld [vmem:[%s4194_s19 + $0x8] sm:$0xff]  ;;  %v358_v14 = vld [vmem:[%s4194_s19 + $0x10] sm:$0xff] }
  0x20   : > { %3466 = vmatmul.msk.f32.vlgmr.msra.gmra.mxu0 %vm422_vm0, %v356_v6  ;;  %v404_v7 = vld [vmem:[%s4189_s13 + $0x80] sm:$0xff]  ;;  %v405_v11 = vld [vmem:[%s4189_s13 + $0x88] sm:$0xff]  ;;  %v406_v15 = vld [vmem:[%s4189_s13 + $0x90] sm:$0xff] }
  0x21   : > { %3514 = vmatmul.msk.f32.vlgmr.msra.gmra.mxu3 %vm422_vm0, %v404_v7  ;;  %v391_v16 = vld [vmem:[%s4189_s13 + $0x18] sm:$0xff]  ;;  %v392_v20 = vld [vmem:[%s4189_s13 + $0x20] sm:$0xff]  ;;  %v393_v24 = vld [vmem:[%s4189_s13 + $0x28] sm:$0xff] }
  0x22   : > { %v375_v17 = vld [vmem:[%s4194_s19 + $0x98] sm:$0xff]  ;;  %v376_v21 = vld [vmem:[%s4194_s19 + $0xa0] sm:$0xff]  ;;  %v377_v25 = vld [vmem:[%s4194_s19 + $0xa8] sm:$0xff] }
  0x23   : > { %v359_v18 = vld [vmem:[%s4194_s19 + $0x18] sm:$0xff]  ;;  %v360_v22 = vld [vmem:[%s4194_s19 + $0x20] sm:$0xff]  ;;  %v361_v26 = vld [vmem:[%s4194_s19 + $0x28] sm:$0xff] }
  0x24   : > { %v407_v19 = vld [vmem:[%s4189_s13 + $0x98] sm:$0xff]  ;;  %v408_v23 = vld [vmem:[%s4189_s13 + $0xa0] sm:$0xff]  ;;  %v409_v27 = vld [vmem:[%s4189_s13 + $0xa8] sm:$0xff] }
  0x25   : > { %v394_v28 = vld [vmem:[%s4189_s13 + $0x30] sm:$0xff]  ;;  %v395_v32 = vld [vmem:[%s4189_s13 + $0x38] sm:$0xff]  ;;  %v396_v36 = vld [vmem:[%s4189_s13 + $0x40] sm:$0xff] }
  0x26   : > { %3499 = vmatmul.msk.f32.gmra.mxu1 %vm422_vm0, %v389_v8  ;;  %v378_v29 = vld [vmem:[%s4194_s19 + $0xb0] sm:$0xff]  ;;  %v379_v33 = vld [vmem:[%s4194_s19 + $0xb8] sm:$0xff]  ;;  %v380_v37 = vld [vmem:[%s4194_s19 + $0xc0] sm:$0xff] }
  0x27   : > { %3483 = vmatmul.msk.f32.gmra.mxu2 %vm422_vm0, %v373_v9  ;;  %v362_v30 = vld [vmem:[%s4194_s19 + $0x30] sm:$0xff]  ;;  %v363_v34 = vld [vmem:[%s4194_s19 + $0x38] sm:$0xff]  ;;  %v364_v38 = vld [vmem:[%s4194_s19 + $0x40] sm:$0xff] }
  0x28   : > { %3467 = vmatmul.msk.f32.gmra.mxu0 %vm422_vm0, %v357_v10  ;;  %v410_v31 = vld [vmem:[%s4189_s13 + $0xb0] sm:$0xff]  ;;  %v411_v35 = vld [vmem:[%s4189_s13 + $0xb8] sm:$0xff]  ;;  %v412_v39 = vld [vmem:[%s4189_s13 + $0xc0] sm:$0xff] }
  0x29   : > { %3515 = vmatmul.msk.f32.gmra.mxu3 %vm422_vm0, %v405_v11  ;;  %v397_v40 = vld [vmem:[%s4189_s13 + $0x48] sm:$0xff]  ;;  %v398_v44 = vld [vmem:[%s4189_s13 + $0x50] sm:$0xff]  ;;  %v399_v48 = vld [vmem:[%s4189_s13 + $0x58] sm:$0xff] }
  0x2a   : > { %v381_v41 = vld [vmem:[%s4194_s19 + $0xc8] sm:$0xff]  ;;  %v382_v45 = vld [vmem:[%s4194_s19 + $0xd0] sm:$0xff]  ;;  %v383_v49 = vld [vmem:[%s4194_s19 + $0xd8] sm:$0xff] }
  0x2b   : > { %v365_v42 = vld [vmem:[%s4194_s19 + $0x48] sm:$0xff]  ;;  %v366_v46 = vld [vmem:[%s4194_s19 + $0x50] sm:$0xff]  ;;  %v367_v50 = vld [vmem:[%s4194_s19 + $0x58] sm:$0xff] }
  0x2c   : > { %v413_v43 = vld [vmem:[%s4189_s13 + $0xc8] sm:$0xff]  ;;  %v414_v47 = vld [vmem:[%s4189_s13 + $0xd0] sm:$0xff]  ;;  %v415_v51 = vld [vmem:[%s4189_s13 + $0xd8] sm:$0xff] }
  0x2d   : > { %v400_v52 = vld [vmem:[%s4189_s13 + $0x60] sm:$0xff]  ;;  %v401_v56 = vld [vmem:[%s4189_s13 + $0x68] sm:$0xff]  ;;  %v402_v60 = vld [vmem:[%s4189_s13 + $0x70] sm:$0xff] }
  0x2e   : > { %3500 = vmatmul.msk.f32.gmra.mxu1 %vm422_vm0, %v390_v12  ;;  %v384_v53 = vld [vmem:[%s4194_s19 + $0xe0] sm:$0xff]  ;;  %v385_v57 = vld [vmem:[%s4194_s19 + $0xe8] sm:$0xff]  ;;  %v386_v61 = vld [vmem:[%s4194_s19 + $0xf0] sm:$0xff] }
  0x2f   : > { %3484 = vmatmul.msk.f32.gmra.mxu2 %vm422_vm0, %v374_v13  ;;  %v368_v54 = vld [vmem:[%s4194_s19 + $0x60] sm:$0xff]  ;;  %v369_v58 = vld [vmem:[%s4194_s19 + $0x68] sm:$0xff]  ;;  %v370_v62 = vld [vmem:[%s4194_s19 + $0x70] sm:$0xff] }
  0x30   : > { %3468 = vmatmul.msk.f32.gmra.mxu0 %vm422_vm0, %v358_v14  ;;  %v416_v55 = vld [vmem:[%s4189_s13 + $0xe0] sm:$0xff]  ;;  %v417_v59 = vld [vmem:[%s4189_s13 + $0xe8] sm:$0xff]  ;;  %v418_v63 = vld [vmem:[%s4189_s13 + $0xf0] sm:$0xff] }
  0x31   : > { %3516 = vmatmul.msk.f32.gmra.mxu3 %vm422_vm0, %v406_v15  ;;  %v403_v0 = vld [vmem:[%s4189_s13 + $0x78] sm:$0xff] }
  0x32   : > { %v387_v1 = vld [vmem:[%s4194_s19 + $0xf8] sm:$0xff] }
  0x33   : > { %v371_v2 = vld [vmem:[%s4194_s19 + $0x78] sm:$0xff] }
  0x34   : > { %v419_v3 = vld [vmem:[%s4189_s13 + $0xf8] sm:$0xff]  ;;  %s3464_s13 = sshll.u32 %s4146_s9, 5 }
  0x35   : > { %p351_p11 = scmp.lt.s32.totalorder %s3464_s13, 63 }
  0x36   : > { %3501 = vmatmul.msk.f32.gmra.mxu1 %vm422_vm0, %v391_v16 }
  0x37   : > { %3485 = vmatmul.msk.f32.gmra.mxu2 %vm422_vm0, %v375_v17  ;;  %s5517_s13 = smov (!%p351_p11, %s3464_s13), 63 }
  0x38   : > { %3469 = vmatmul.msk.f32.gmra.mxu0 %vm422_vm0, %v359_v18  ;;  %s3465_s17 = sshll.u32 %s5517_s13, 3 }
  0x39   : > { %3517 = vmatmul.msk.f32.gmra.mxu3 %vm422_vm0, %v407_v19  ;;  %s5153_s21 = scalar_lea.vmem %s5471_s6, %s3465_s17  ;;  %s5407_s17 = sshll.u32 %s3317_s24, 4  ;;  %s3322_s17 = int_to_ptr.hbm [resolvable:$true] %s5407_s17 }
  0x3a   : > { %s3997_s22 = sshra.s32 %s3322_s17, 4  ;;  %s3998_s22 = int_to_ptr.hbm [resolvable:$true] %s3997_s22 }
  0x3b   : > { %s3999_s23 = scalar_lea.hbm %s3998_s22, 1  ;;  %p4004_p1 = scmp.lt.s32.totalorder %s3998_s22, %s5472_s7 }
  0x3c   : > { %p4000_p12 = scmp.ne.s32.totalorder %s3998_s22, %s3999_s23  ;;  %p4005_p2 = scmp.lt.s32.totalorder %s4003_s26, %s3999_s23 }
  0x3e   : > { %3502 = vmatmul.msk.f32.gmra.mxu1 %vm422_vm0, %v392_v20  ;;  %p4001_p13 = pnand %p4000_p12, %p4163_p5  ;;  %p4006_p3 = por %p4005_p2, %p4004_p1 }
  0x3f   : > { %3486 = vmatmul.msk.f32.gmra.mxu2 %vm422_vm0, %v376_v21 }
  0x40   : > { %3470 = vmatmul.msk.f32.gmra.mxu0 %vm422_vm0, %v360_v22  ;;  %p4002_p0 = pneg %p4001_p13 }
  0x41   : > { %3518 = vmatmul.msk.f32.gmra.mxu3 %vm422_vm0, %v408_v23 }
  0x42   : > { %p4007_p4 = pnand %p4006_p3, %p4002_p0 }
  0x46   : > { %3503 = vmatmul.msk.f32.gmra.mxu1 %vm422_vm0, %v393_v24 }
  0x47   : > { %3487 = vmatmul.msk.f32.gmra.mxu2 %vm422_vm0, %v377_v25 }
  0x48   : > { %3471 = vmatmul.msk.f32.gmra.mxu0 %vm422_vm0, %v361_v26 }
  0x49   : > { %3519 = vmatmul.msk.f32.gmra.mxu3 %vm422_vm0, %v409_v27 }
  0x4e   : > { %3504 = vmatmul.msk.f32.gmra.mxu1 %vm422_vm0, %v394_v28 }
  0x4f   : > { %3488 = vmatmul.msk.f32.gmra.mxu2 %vm422_vm0, %v378_v29 }
  0x50   : > { %3472 = vmatmul.msk.f32.gmra.mxu0 %vm422_vm0, %v362_v30 }
  0x51   : > { %3520 = vmatmul.msk.f32.gmra.mxu3 %vm422_vm0, %v410_v31 }
  0x56   : > { %3505 = vmatmul.msk.f32.gmra.mxu1 %vm422_vm0, %v395_v32 }
  0x57   : > { %3489 = vmatmul.msk.f32.gmra.mxu2 %vm422_vm0, %v379_v33 }
  0x58   : > { %3473 = vmatmul.msk.f32.gmra.mxu0 %vm422_vm0, %v363_v34 }
  0x59   : > { %3521 = vmatmul.msk.f32.gmra.mxu3 %vm422_vm0, %v411_v35 }
  0x5e   : > { %3506 = vmatmul.msk.f32.gmra.mxu1 %vm422_vm0, %v396_v36 }
  0x5f   : > { %3490 = vmatmul.msk.f32.gmra.mxu2 %vm422_vm0, %v380_v37 }
  0x60   : > { %3474 = vmatmul.msk.f32.gmra.mxu0 %vm422_vm0, %v364_v38 }
  0x61   : > { %3522 = vmatmul.msk.f32.gmra.mxu3 %vm422_vm0, %v412_v39 }
  0x66   : > { %3507 = vmatmul.msk.f32.gmra.mxu1 %vm422_vm0, %v397_v40 }
  0x67   : > { %3491 = vmatmul.msk.f32.gmra.mxu2 %vm422_vm0, %v381_v41 }
  0x68   : > { %3475 = vmatmul.msk.f32.gmra.mxu0 %vm422_vm0, %v365_v42 }
  0x69   : > { %3523 = vmatmul.msk.f32.gmra.mxu3 %vm422_vm0, %v413_v43 }
  0x6e   : > { %3508 = vmatmul.msk.f32.gmra.mxu1 %vm422_vm0, %v398_v44 }
  0x6f   : > { %3492 = vmatmul.msk.f32.gmra.mxu2 %vm422_vm0, %v382_v45 }
  0x70   : > { %3476 = vmatmul.msk.f32.gmra.mxu0 %vm422_vm0, %v366_v46 }
  0x71   : > { %3524 = vmatmul.msk.f32.gmra.mxu3 %vm422_vm0, %v414_v47 }
  0x76   : > { %3509 = vmatmul.msk.f32.gmra.mxu1 %vm422_vm0, %v399_v48 }
  0x77   : > { %3493 = vmatmul.msk.f32.gmra.mxu2 %vm422_vm0, %v383_v49 }
  0x78   : > { %3477 = vmatmul.msk.f32.gmra.mxu0 %vm422_vm0, %v367_v50 }
  0x79   : > { %3525 = vmatmul.msk.f32.gmra.mxu3 %vm422_vm0, %v415_v51 }
  0x7e   : > { %3510 = vmatmul.msk.f32.gmra.mxu1 %vm422_vm0, %v400_v52 }
  0x7f   : > { %3494 = vmatmul.msk.f32.gmra.mxu2 %vm422_vm0, %v384_v53 }
  0x80   : > { %3478 = vmatmul.msk.f32.gmra.mxu0 %vm422_vm0, %v368_v54 }
  0x81   : > { %3526 = vmatmul.msk.f32.gmra.mxu3 %vm422_vm0, %v416_v55 }
  0x86   : > { %3511 = vmatmul.msk.f32.gmra.mxu1 %vm422_vm0, %v401_v56 }
  0x87   : > { %3495 = vmatmul.msk.f32.gmra.mxu2 %vm422_vm0, %v385_v57 }
  0x88   : > { %3479 = vmatmul.msk.f32.gmra.mxu0 %vm422_vm0, %v369_v58 }
  0x89   : > { %3527 = vmatmul.msk.f32.gmra.mxu3 %vm422_vm0, %v417_v59 }
  0x8e   : > { %3512 = vmatmul.msk.f32.gmra.mxu1 %vm422_vm0, %v402_v60 }
  0x8f   : > { %3496 = vmatmul.msk.f32.gmra.mxu2 %vm422_vm0, %v386_v61 }
  0x90   : > { %3480 = vmatmul.msk.f32.gmra.mxu0 %vm422_vm0, %v370_v62 }
  0x91   : > { %3528 = vmatmul.msk.f32.gmra.mxu3 %vm422_vm0, %v418_v63 }
  0x96   : > { %3513 = vmatmul.msk.f32.gmra.mxu1 %vm422_vm0, %v403_v0 }
  0x97   : > { %3497 = vmatmul.msk.f32.gmra.mxu2 %vm422_vm0, %v387_v1 }
  0x98   : > { %3481 = vmatmul.msk.f32.gmra.mxu0 %vm422_vm0, %v371_v2 }
  0x99   : > { %3529 = vmatmul.msk.f32.gmra.mxu3 %vm422_vm0, %v419_v3 }
  0x9b   : > { %v747_v4 = vpop.f32.mrf.mxu1 }
  0x9d   : > { %v536_v5 = vpop.f32.mrf.mxu0 }
  0xa2   : > { %v4324_v6 = vpop.f32.mrf.mxu2 }
  0xa3   : > { %v750_v7 = vpop.f32.mrf.mxu1 }
  0xa4   : > { %3530 = vmatpush.xpose.msk.msrb.mxu2 %vm422_vm0, %v750_v7  ;;  %v3743_v8 = vpack.i.bf16 %v747_v4, %v750_v7  ;;  %v4327_v10 = vpop.f32.mrf.mxu3 }
  0xa5   : > { %v539_v9 = vpop.f32.mrf.mxu0 }
  0xa6   : > { %3744 = vrot.lane.b32.xlu0 %v3743_v8, %s4079_s20 }
  0xa8   : > { %3531 = vmatpush.xpose.msk.msrb.mxu2 %vm422_vm0, %v747_v4 }
  0xaa   : > { %v4331_v11 = vpop.f32.mrf.mxu2 }
  0xab   : > { %v753_v12 = vpop.f32.mrf.mxu1  ;;  %3532 = vmatmul.msk.f32.vlgmr.msrb.gmra.mxu2 %vm422_vm0, %v536_v5 }
  0xac   : > { %v4334_v14 = vpop.f32.mrf.mxu3 }
  0xad   : > { %v542_v13 = vpop.f32.mrf.mxu0 }
  0xb2   : > { %v4336_v15 = vpop.f32.mrf.mxu2 }
  0xb3   : > { %v756_v16 = vpop.f32.mrf.mxu1  ;;  %3533 = vmatmul.msk.f32.gmra.mxu2 %vm422_vm0, %v539_v9 }
  0xb4   : > { %3534 = vmatpush.xpose.msk.msrb.mxu3 %vm422_vm0, %v756_v16  ;;  %v4340_v18 = vpop.f32.mrf.mxu3  ;;  %v3748_v19 = vpack.i.bf16 %v753_v12, %v756_v16 }
  0xb5   : > { %v545_v17 = vpop.f32.mrf.mxu0 }
  0xb6   : > { %3749 = vrot.lane.b32.xlu1 %v3748_v19, %s4079_s20 }
  0xb8   : > { %3535 = vmatpush.xpose.msk.msrb.mxu3 %vm422_vm0, %v753_v12 }
  0xba   : > { %v4344_v20 = vpop.f32.mrf.mxu2 }
  0xbb   : > { %v759_v21 = vpop.f32.mrf.mxu1  ;;  %3536 = vmatmul.msk.f32.vlgmr.msrb.gmra.mxu3 %vm422_vm0, %v542_v13 }
  0xbc   : > { %v4347_v23 = vpop.f32.mrf.mxu3 }
  0xbd   : > { %v548_v22 = vpop.f32.mrf.mxu0 }
  0xc2   : > { %v4349_v24 = vpop.f32.mrf.mxu2 }
  0xc3   : > { %v762_v25 = vpop.f32.mrf.mxu1  ;;  %3537 = vmatmul.msk.f32.gmra.mxu3 %vm422_vm0, %v545_v17 }
  0xc4   : > { %3538 = vmatpush.xpose.msk.msra.mxu2 %vm422_vm0, %v762_v25  ;;  %v3753_v27 = vpack.i.bf16 %v759_v21, %v762_v25  ;;  %v4353_v28 = vpop.f32.mrf.mxu3 }
  0xc5   : > { %v551_v26 = vpop.f32.mrf.mxu0 }
  0xc6   : > { %3754 = vrot.lane.b32.xlu2 %v3753_v27, %s4079_s20 }
  0xc8   : > { %3539 = vmatpush.xpose.msk.msra.mxu2 %vm422_vm0, %v759_v21 }
  0xca   : > { %v4357_v29 = vpop.f32.mrf.mxu2 }
  0xcb   : > { %v765_v30 = vpop.f32.mrf.mxu1  ;;  %3540 = vmatmul.msk.f32.vlgmr.msra.gmra.mxu2 %vm422_vm0, %v548_v22 }
  0xcc   : > { %v4360_v32 = vpop.f32.mrf.mxu3 }
  0xcd   : > { %v554_v31 = vpop.f32.mrf.mxu0 }
  0xd2   : > { %v4362_v33 = vpop.f32.mrf.mxu2 }
  0xd3   : > { %v768_v34 = vpop.f32.mrf.mxu1  ;;  %3541 = vmatmul.msk.f32.gmra.mxu2 %vm422_vm0, %v551_v26 }
  0xd4   : > { %v3758_v35 = vpack.i.bf16 %v765_v30, %v768_v34  ;;  %3542 = vmatpush.xpose.msk.msra.mxu3 %vm422_vm0, %v768_v34  ;;  %v4370_v38 = vpop.f32.mrf.mxu3 }
  0xd5   : > { %v557_v36 = vpop.f32.mrf.mxu0 }
  0xd6   : > { %3759 = vrot.lane.b32.xlu0 %v3758_v35, %s4079_s20 }
  0xd8   : > { %3543 = vmatpush.xpose.msk.msra.mxu3 %vm422_vm0, %v765_v30 }
  0xda   : > { %v4368_v37 = vpop.f32.mrf.mxu2 }
  0xdb   : > { %v771_v39 = vpop.f32.mrf.mxu1  ;;  %3544 = vmatmul.msk.f32.vlgmr.msra.gmra.mxu3 %vm422_vm0, %v554_v31 }
  0xdc   : > { %v4377_v45 = vpop.f32.mrf.mxu3 }
  0xdd   : > { %v560_v40 = vpop.f32.mrf.mxu0 }
  0xe2   : > { %v4373_v41 = vpop.f32.mrf.mxu2 }
  0xe3   : > { %v774_v42 = vpop.f32.mrf.mxu1  ;;  %3545 = vmatmul.msk.f32.gmra.mxu3 %vm422_vm0, %v557_v36 }
  0xe4   : > { %v3763_v43 = vpack.i.bf16 %v771_v39, %v774_v42  ;;  %3546 = vmatpush.xpose.msk.msrb.mxu2 %vm422_vm0, %v774_v42  ;;  %v4384_v49 = vpop.f32.mrf.mxu3 }
  0xe5   : > { %v563_v44 = vpop.f32.mrf.mxu0 }
  0xe6   : > { %3764 = vrot.lane.b32.xlu2 %v3763_v43, %s4079_s20 }
  0xe8   : > { %3547 = vmatpush.xpose.msk.msrb.mxu2 %vm422_vm0, %v771_v39 }
  0xea   : > { %v4381_v46 = vpop.f32.mrf.mxu2 }
  0xeb   : > { %v777_v47 = vpop.f32.mrf.mxu1  ;;  %3548 = vmatmul.msk.f32.vlgmr.msrb.gmra.mxu2 %vm422_vm0, %v560_v40 }
  0xec   : > { %v4392_v54 = vpop.f32.mrf.mxu3 }
  0xed   : > { %v566_v48 = vpop.f32.mrf.mxu0 }
  0xf2   : > { %v4386_v50 = vpop.f32.mrf.mxu2 }
  0xf3   : > { %v780_v51 = vpop.f32.mrf.mxu1  ;;  %3549 = vmatmul.msk.f32.gmra.mxu2 %vm422_vm0, %v563_v44 }
  0xf4   : > { %v3768_v52 = vpack.i.bf16 %v777_v47, %v780_v51  ;;  %3550 = vmatpush.xpose.msk.msrb.mxu3 %vm422_vm0, %v780_v51  ;;  %v4399_v58 = vpop.f32.mrf.mxu3 }
  0xf5   : > { %v569_v53 = vpop.f32.mrf.mxu0 }
  0xf6   : > { %3769 = vrot.lane.b32.xlu1 %v3768_v52, %s4079_s20 }
  0xf8   : > { %3551 = vmatpush.xpose.msk.msrb.mxu3 %vm422_vm0, %v777_v47 }
  0xfa   : > { %v4397_v56 = vpop.f32.mrf.mxu2 }
  0xfb   : > { %v4394_v55 = vpop.f32.mrf.mxu1  ;;  %3552 = vmatmul.msk.f32.vlgmr.msrb.gmra.mxu3 %vm422_vm0, %v566_v48 }
  0xfc   : > { %v4415_v63 = vpop.f32.mrf.mxu3 }
  0xfd   : > { %v572_v57 = vpop.f32.mrf.mxu0 }
 0x102   : > { %v4406_v60 = vpop.f32.mrf.mxu2 }
 0x103   : > { %v4401_v59 = vpop.f32.mrf.mxu1  ;;  %3553 = vmatmul.msk.f32.gmra.mxu3 %vm422_vm0, %v569_v53 }
 0x104   : > { %3554 = vmatpush.xpose.msk.msra.mxu2 %vm422_vm0, %v4401_v59  ;;  %v4430_v3 = vpop.f32.mrf.mxu3 }
 0x105   : > { %v575_v62 = vpop.f32.mrf.mxu0  ;;  %5482 = vst [vmem:[#allocation8_spill] sm:$0xff] %v4430_v3 }
 0x108   : > { %3555 = vmatpush.xpose.msk.msra.mxu2 %vm422_vm0, %v4394_v55 }
 0x10a   : > { %v4421_v0 = vpop.f32.mrf.mxu2 }
 0x10b   : > { %v4412_v61 = vpop.f32.mrf.mxu1  ;;  %3556 = vmatmul.msk.f32.vlgmr.msra.gmra.mxu2 %vm422_vm0, %v572_v57 }
 0x10c   : > { %3562 = vmatpush.xpose.msk.msrb.mxu2 %vm422_vm0, %v4334_v14  ;;  %v4447_v7 = vpop.f32.mrf.mxu3 }
 0x10d   : > { %v578_v2 = vpop.f32.mrf.mxu0  ;;  %5483 = vst [vmem:[#allocation9_spill] sm:$0xff] %v4447_v7 }
 0x110   : > { %3563 = vmatpush.xpose.msk.msrb.mxu2 %vm422_vm0, %v4327_v10 }
 0x112   : > { %v4436_v4 = vpop.f32.mrf.mxu2 }
 0x113   : > { %v4425_v1 = vpop.f32.mrf.mxu1  ;;  %3557 = vmatmul.msk.f32.gmra.mxu2 %vm422_vm0, %v575_v62 }
 0x114   : > { %3570 = vmatpush.xpose.msk.msra.mxu2 %vm422_vm0, %v4360_v32  ;;  %3558 = vmatpush.xpose.msk.msra.mxu3 %vm422_vm0, %v4425_v1  ;;  %v4458_v8 = vpop.f32.mrf.mxu3 }
 0x115   : > { %v581_v5 = vpop.f32.mrf.mxu0  ;;  %5484 = vst [vmem:[#allocation10_spill] sm:$0xff] %v4458_v8 }
 0x118   : > { %3571 = vmatpush.xpose.msk.msra.mxu2 %vm422_vm0, %v4353_v28  ;;  %3559 = vmatpush.xpose.msk.msra.mxu3 %vm422_vm0, %v4412_v61  ;;  %v3745_v16 = vpop.permute.xlu0 %3744 }
 0x119   : > { %v3746_v21 = vunpack.i.l.bf16 %v3745_v16 }
 0x11b   : > { %3560 = vmatmul.msk.f32.vlgmr.msra.gmra.mxu3 %vm422_vm0, %v578_v2  ;;  %3564 = vmatmul.msk.f32.vlgmr.msrb.gmra.mxu2 %vm422_vm0, %v4324_v6  ;;  %v4456_v6 = vpop.f32.mrf.mxu2 }
 0x11c   : > { %3566 = vmatpush.xpose.msk.msrb.mxu3 %vm422_vm0, %v4347_v23  ;;  %3578 = vmatpush.xpose.msk.msrb.mxu2 %vm422_vm0, %v4392_v54  ;;  %v4480_v13 = vpop.f32.mrf.mxu3 }
 0x11d   : > { %5485 = vst [vmem:[#allocation11_spill] sm:$0xff] %v4480_v13 }
 0x120   : > { %3567 = vmatpush.xpose.msk.msrb.mxu3 %vm422_vm0, %v4340_v18  ;;  %3579 = vmatpush.xpose.msk.msrb.mxu2 %vm422_vm0, %v4384_v49  ;;  %v3755_v30 = vpop.permute.xlu2 %3754 }
 0x121   : > { %v3756_v34 = vunpack.i.l.bf16 %v3755_v30  ;;  %v3757_v36 = vunpack.i.h.bf16 %v3755_v30 }
 0x123   : > { %3561 = vmatmul.msk.f32.gmra.mxu3 %vm422_vm0, %v581_v5  ;;  %3565 = vmatmul.msk.f32.gmra.mxu2 %vm422_vm0, %v4331_v11 }
 0x124   : > { %3574 = vmatpush.xpose.msk.msra.mxu3 %vm422_vm0, %v4377_v45 }
 0x128   : > { %3575 = vmatpush.xpose.msk.msra.mxu3 %vm422_vm0, %v4370_v38  ;;  %v3750_v27 = vpop.permute.xlu1 %3749 }
 0x129   : > { %v3752_v35 = vunpack.i.h.bf16 %v3750_v27 }
 0x12b   : > { %3568 = vmatmul.msk.f32.vlgmr.msrb.gmra.mxu3 %vm422_vm0, %v4336_v15  ;;  %3572 = vmatmul.msk.f32.vlgmr.msra.gmra.mxu2 %vm422_vm0, %v4349_v24 }
 0x12c   : > { %3586 = vmatpush.xpose.msk.msra.mxu2 %vm422_vm0, %v4447_v7  ;;  %3582 = vmatpush.xpose.msk.msrb.mxu3 %vm422_vm0, %v4415_v63 }
 0x12e   : > { %v872_v9 = vpop.f32.mrf.mxu2 }
 0x12f   : > { %v4468_v12 = vmul.f32 0.35355338, %v872_v9 }
 0x130   : > { %3587 = vmatpush.xpose.msk.msra.mxu2 %vm422_vm0, %v4430_v3  ;;  %3583 = vmatpush.xpose.msk.msrb.mxu3 %vm422_vm0, %v4399_v58 }
 0x131   : > { %v1435_v11 = vsel %vm422_vm0, %v4468_v12, -inf }
 0x132   : > { %1436 = vmax.xlane.f32.xlu0 %v1435_v11 }
 0x133   : > { %3569 = vmatmul.msk.f32.gmra.mxu3 %vm422_vm0, %v4344_v20  ;;  %3573 = vmatmul.msk.f32.gmra.mxu2 %vm422_vm0, %v4357_v29  ;;  %v3747_v20 = vunpack.i.h.bf16 %v3745_v16 }
 0x136   : > { %v875_v15 = vpop.f32.mrf.mxu2 }
 0x137   : > { %v4482_v17 = vmul.f32 0.35355338, %v875_v15 }
 0x139   : > { %v1438_v19 = vsel %vm422_vm0, %v4482_v17, -inf }
 0x13a   : > { %1439 = vmax.xlane.f32.xlu0 %v1438_v19 }
 0x13b   : > { %3576 = vmatmul.msk.f32.vlgmr.msra.gmra.mxu3 %vm422_vm0, %v4362_v33  ;;  %3580 = vmatmul.msk.f32.vlgmr.msrb.gmra.mxu2 %vm422_vm0, %v4373_v41  ;;  %v3751_v33 = vunpack.i.l.bf16 %v3750_v27 }
 0x13c   : > { %2229 = vmatpush.msrb.mxu2 %v3746_v21  ;;  %3590 = vmatpush.xpose.msk.msra.mxu3 %vm422_vm0, %v4480_v13 }
 0x13e   : > { %2230 = vmatpush.msrb.mxu2 %v3747_v20  ;;  %v907_v22 = vpop.f32.mrf.mxu3 }
 0x13f   : > { %v4492_v24 = vmul.f32 0.35355338, %v907_v22 }
 0x140   : > { %3591 = vmatpush.xpose.msk.msra.mxu3 %vm422_vm0, %v4458_v8 }
 0x141   : > { %v1441_v25 = vsel %vm422_vm0, %v4492_v24, -inf }
 0x142   : > { %1442 = vmax.xlane.f32.xlu1 %v1441_v25 }
 0x143   : > { %3577 = vmatmul.msk.f32.gmra.mxu3 %vm422_vm0, %v4368_v37  ;;  %3581 = vmatmul.msk.f32.gmra.mxu2 %vm422_vm0, %v4381_v46 }
 0x146   : > { %v910_v26 = vpop.f32.mrf.mxu3 }
 0x147   : > { %v4502_v29 = vmul.f32 0.35355338, %v910_v26 }
 0x148   : > { %v3760_v43 = vpop.permute.xlu0 %3759 }
 0x149   : > { %v1444_v31 = vsel %vm422_vm0, %v4502_v29, -inf  ;;  %v3761_v46 = vunpack.i.l.bf16 %v3760_v43  ;;  %v3762_v47 = vunpack.i.h.bf16 %v3760_v43 }
 0x14a   : > { %1445 = vmax.xlane.f32.xlu1 %v1444_v31 }
 0x14b   : > { %3584 = vmatmul.msk.f32.vlgmr.msrb.gmra.mxu3 %vm422_vm0, %v4386_v50  ;;  %3588 = vmatmul.msk.f32.vlgmr.msra.gmra.mxu2 %vm422_vm0, %v4406_v60 }
 0x14c   : > { %2264 = vmatpush.msrb.mxu3 %v3751_v33  ;;  %2299 = vmatpush.msra.mxu2 %v3756_v34 }
 0x14e   : > { %2265 = vmatpush.msrb.mxu3 %v3752_v35  ;;  %v942_v37 = vpop.f32.mrf.mxu2  ;;  %2300 = vmatpush.msra.mxu2 %v3757_v36 }
 0x14f   : > { %v4510_v39 = vmul.f32 0.35355338, %v942_v37 }
 0x151   : > { %v1447_v40 = vsel %vm422_vm0, %v4510_v39, -inf }
 0x152   : > { %1448 = vmax.xlane.f32.xlu2 %v1447_v40 }
 0x153   : > { %3585 = vmatmul.msk.f32.gmra.mxu3 %vm422_vm0, %v4397_v56  ;;  %3589 = vmatmul.msk.f32.gmra.mxu2 %vm422_vm0, %v4421_v0 }
 0x156   : > { %v945_v41 = vpop.f32.mrf.mxu2 }
 0x157   : > { %v4518_v42 = vmul.f32 0.35355338, %v945_v41 }
 0x159   : > { %v1450_v44 = vsel %vm422_vm0, %v4518_v42, -inf }
 0x15a   : > { %1451 = vmax.xlane.f32.xlu2 %v1450_v44 }
 0x15b   : > { %3592 = vmatmul.msk.f32.vlgmr.msra.gmra.mxu3 %vm422_vm0, %v4436_v4 }
 0x15c   : > { %2334 = vmatpush.msra.mxu3 %v3761_v46 }
 0x15e   : > { %v977_v48 = vpop.f32.mrf.mxu3  ;;  %2335 = vmatpush.msra.mxu3 %v3762_v47 }
 0x15f   : > { %v4524_v50 = vmul.f32 0.35355338, %v977_v48 }
 0x161   : > { %v1453_v51 = vsel %vm422_vm0, %v4524_v50, -inf }
 0x162   : > { %1454 = vmax.xlane.f32.xlu0 %v1453_v51 }
 0x163   : > { %3593 = vmatmul.msk.f32.gmra.mxu3 %vm422_vm0, %v4456_v6 }
 0x166   : > { %v980_v52 = vpop.f32.mrf.mxu3 }
 0x167   : > { %v4530_v53 = vmul.f32 0.35355338, %v980_v52 }
 0x168   : > { %v4573_v48 = vpop.permute.xlu1 %3769 }
 0x169   : > { %v1456_v56 = vsel %vm422_vm0, %v4530_v53, -inf }
 0x16a   : > { %1457 = vmax.xlane.f32.xlu2 %v1456_v56 }
 0x16e   : > { %v1012_v57 = vpop.f32.mrf.mxu2 }
 0x16f   : > { %v4534_v60 = vmul.f32 0.35355338, %v1012_v57 }
 0x171   : > { %v1459_v62 = vsel %vm422_vm0, %v4534_v60, -inf }
 0x172   : > { %1460 = vmax.xlane.f32.xlu1 %v1459_v62 }
 0x176   : > { %v1015_v0 = vpop.f32.mrf.mxu2 }
 0x177   : > { %v4538_v2 = vmul.f32 0.35355338, %v1015_v0 }
 0x179   : > { %v1462_v4 = vsel %vm422_vm0, %v4538_v2, -inf }
 0x17a   : > { %1463 = vmax.xlane.f32.xlu1 %v1462_v4 }
 0x17e   : > { %v1047_v5 = vpop.f32.mrf.mxu3 }
 0x17f   : > { %v4542_v6 = vmul.f32 0.35355338, %v1047_v5 }
 0x181   : > { %v1465_v9 = vsel %vm422_vm0, %v4542_v6, -inf }
 0x182   : > { %1466 = vmax.xlane.f32.xlu1 %v1465_v9 }
 0x186   : > { %v1050_v11 = vpop.f32.mrf.mxu3 }
 0x187   : > { %v4546_v15 = vmul.f32 0.35355338, %v1050_v11 }
 0x189   : > { %v1468_v16 = vsel %vm422_vm0, %v4546_v15, -inf }
 0x18a   : > { %1469 = vmax.xlane.f32.xlu2 %v1468_v16 }
 0x18e   : > { %v1082_v19 = vpop.f32.mrf.mxu2 }
 0x18f   : > { %v4550_v21 = vmul.f32 0.35355338, %v1082_v19 }
 0x191   : > { %v1471_v20 = vsel %vm422_vm0, %v4550_v21, -inf }
 0x192   : > { %1472 = vmax.xlane.f32.xlu2 %v1471_v20 }
 0x196   : > { %v1085_v22 = vpop.f32.mrf.mxu2 }
 0x197   : > { %v4554_v25 = vmul.f32 0.35355338, %v1085_v22 }
 0x199   : > { %v1474_v26 = vsel %vm422_vm0, %v4554_v25, -inf }
 0x19a   : > { %1475 = vmax.xlane.f32.xlu1 %v1474_v26 }
 0x19e   : > { %v1117_v27 = vpop.f32.mrf.mxu3  ;;  %v1152_v30 = vpop.f32.mrf.mxu2 }
 0x19f   : > { %v4558_v31 = vmul.f32 0.35355338, %v1117_v27  ;;  %v4560_v33 = vmul.f32 0.35355338, %v1152_v30  ;;  %v4595_v30 = vpop.permute.xlu2 %3764 }
 0x1a1   : > { %v1483_v34 = vsel %vm422_vm0, %v4560_v33, -inf  ;;  %v1477_v35 = vsel %vm422_vm0, %v4558_v31, -inf }
 0x1a2   : > { %1484 = vmax.xlane.f32.xlu0 %v1483_v34  ;;  %1478 = vmax.xlane.f32.xlu2 %v1477_v35 }
 0x1a5   : > { %v1437_v36 = vpop.xlane.xlu0 %1436 }
 0x1a6   : > { %v1120_v37 = vpop.f32.mrf.mxu3  ;;  %v1155_v40 = vpop.f32.mrf.mxu2  ;;  %v1531_v43 = vsub.f32 %v4468_v12, %v1437_v36 }
 0x1a7   : > { %v4566_v41 = vmul.f32 0.35355338, %v1120_v37  ;;  %v4571_v47 = vmul.f32 0.35355338, %v1155_v40 }
 0x1a8   : > { %v1563_v46 = vmul.f32 1.442695, %v1531_v43 }
 0x1a9   : > { %v1480_v44 = vsel %vm422_vm0, %v4566_v41, -inf  ;;  %v1486_v4 = vsel %vm422_vm0, %v4571_v47, -inf }
 0x1aa   : > { %1481 = vmax.xlane.f32.xlu1 %v1480_v44  ;;  %3823 = vpow2.f32 %v1563_v46 }
 0x1ad   : > { %v1440_v51 = vpop.xlane.xlu0 %1439 }
 0x1ae   : > { %v1532_v52 = vsub.f32 %v4482_v17, %v1440_v51  ;;  %v1187_v56 = vpop.f32.mrf.mxu3  ;;  %v1222_v57 = vpop.f32.mrf.mxu2 }
 0x1af   : > { %v4576_v62 = vmul.f32 0.35355338, %v1222_v57  ;;  %v4597_v35 = vmul.f32 0.35355338, %v1187_v56 }
 0x1b0   : > { %v1565_v0 = vmul.f32 1.442695, %v1532_v52  ;;  %v4583_v16 = vpop.eup %3823 }
 0x1b1   : > { %v1495_v12 = vsel %vm422_vm0, %v4576_v62, -inf  ;;  %v1489_v46 = vsel %vm422_vm0, %v4597_v35, -inf }
 0x1b2   : > { %3825 = vpow2.f32 %v1565_v0  ;;  %1496 = vmax.xlane.f32.xlu0 %v1495_v12  ;;  %1487 = vmax.xlane.f32.xlu1 %v1486_v4 }
 0x1b5   : > { %v1443_v5 = vpop.xlane.xlu1 %1442 }
 0x1b6   : > { %v1533_v9 = vsub.f32 %v4492_v24, %v1443_v5  ;;  %v1190_v11 = vpop.f32.mrf.mxu3  ;;  %v1225_v17 = vpop.f32.mrf.mxu2  ;;  %v1627_v24 = vsel %vm422_vm0, %v4583_v16, 0.0 }
 0x1b7   : > { %v4585_v19 = vmul.f32 0.35355338, %v1225_v17 }
 0x1b8   : > { %v4587_v20 = vpop.eup %3825  ;;  %v1567_v22 = vmul.f32 1.442695, %v1533_v9  ;;  %v3773_v9 = vpack.i.bf16 %v4394_v55, %v4401_v59 }
 0x1b9   : > { %v1630_v26 = vsel %vm422_vm0, %v4587_v20, 0.0  ;;  %v1498_v27 = vsel %vm422_vm0, %v4585_v19, -inf }
 0x1ba   : > { %3827 = vpow2.f32 %v1567_v22  ;;  %1631 = vadd.xlane.f32.xlu0 %v1630_v26  ;;  %1499 = vmax.xlane.f32.xlu2 %v1498_v27 }
 0x1bb   : > { %1628 = vadd.xlane.f32.xlu1 %v1627_v24 }
 0x1bd   : > { %v1446_v34 = vpop.xlane.xlu1 %1445 }
 0x1be   : > { %v1534_v36 = vsub.f32 %v4502_v29, %v1446_v34  ;;  %v1257_v37 = vpop.f32.mrf.mxu3  ;;  %v1292_v5 = vpop.f32.mrf.mxu2 }
 0x1c0   : > { %v4600_v40 = vpop.eup %3827  ;;  %v1569_v43 = vmul.f32 1.442695, %v1534_v36 }
 0x1c1   : > { %v1633_v44 = vsel %vm422_vm0, %v4600_v40, 0.0 }
 0x1c2   : > { %3829 = vpow2.f32 %v1569_v43  ;;  %1634 = vadd.xlane.f32.xlu2 %v1633_v44 }
 0x1c3   : > { %1490 = vmax.xlane.f32.xlu1 %v1489_v46 }
 0x1c5   : > { %v1449_v51 = vpop.xlane.xlu2 %1448 }
 0x1c6   : > { %v1535_v52 = vsub.f32 %v4510_v39, %v1449_v51  ;;  %v1260_v56 = vpop.f32.mrf.mxu3  ;;  %v4618_v39 = vmul.f32 0.35355338, %v1292_v5 }
 0x1c7   : > { %v4607_v57 = vmul.f32 0.35355338, %v1260_v56 }
 0x1c8   : > { %v4609_v29 = vpop.eup %3829  ;;  %v1571_v0 = vmul.f32 1.442695, %v1535_v52  ;;  %v1507_v26 = vsel %vm422_vm0, %v4618_v39, -inf  ;;  %v4632_v52 = vmul.f32 0.35355338, %v1190_v11 }
 0x1c9   : > { %v1636_v12 = vsel %vm422_vm0, %v4609_v29, 0.0  ;;  %v1504_v4 = vsel %vm422_vm0, %v4607_v57, -inf }
 0x1ca   : > { %3831 = vpow2.f32 %v1571_v0  ;;  %1637 = vadd.xlane.f32.xlu2 %v1636_v12 }
 0x1cb   : > { %1505 = vmax.xlane.f32.xlu1 %v1504_v4  ;;  %v1492_v4 = vsel %vm422_vm0, %v4632_v52, -inf }
 0x1cd   : > { %v1452_v43 = vpop.xlane.xlu2 %1451 }
 0x1ce   : > { %3774 = vrot.lane.b32.xlu0 %v3773_v9, %s4079_s20  ;;  %v3778_v9 = vpack.i.bf16 %v4412_v61, %v4425_v1 }
 0x1d0   : > { %v4620_v17 = vpop.eup %3831 }
 0x1d1   : > { %v1639_v22 = vsel %vm422_vm0, %v4620_v17, 0.0 }
 0x1d2   : > { %1640 = vadd.xlane.f32.xlu2 %v1639_v22 }
 0x1d3   : > { %1508 = vmax.xlane.f32.xlu1 %v1507_v26 }
 0x1d5   : > { %v1455_v27 = vpop.xlane.xlu0 %1454 }
 0x1d6   : > { %v1537_v24 = vsub.f32 %v4524_v50, %v1455_v27  ;;  %v1536_v50 = vsub.f32 %v4518_v42, %v1452_v43  ;;  %v4645_v42 = vmul.f32 0.35355338, %v1257_v37 }
 0x1d8   : > { %v1575_v34 = vmul.f32 1.442695, %v1537_v24  ;;  %v1573_v11 = vmul.f32 1.442695, %v1536_v50  ;;  %v1501_v61 = vsel %vm422_vm0, %v4645_v42, -inf }
 0x1da   : > { %3833 = vpow2.f32 %v1575_v34 }
 0x1dd   : > { %v1458_v56 = vpop.xlane.xlu2 %1457 }
 0x1de   : > { %v1538_v26 = vsub.f32 %v4530_v53, %v1458_v56 }
 0x1e0   : > { %v4627_v55 = vpop.eup %3833 }
 0x1e1   : > { %v1645_v59 = vsel %vm422_vm0, %v4627_v55, 0.0 }
 0x1e2   : > { %1646 = vadd.xlane.f32.xlu2 %v1645_v59  ;;  %v1577_v59 = vmul.f32 1.442695, %v1538_v26 }
 0x1e5   : > { %v1461_v36 = vpop.xlane.xlu1 %1460 }
 0x1e6   : > { %v1539_v53 = vsub.f32 %v4534_v60, %v1461_v36 }
 0x1ed   : > { %v1464_v44 = vpop.xlane.xlu1 %1463 }
 0x1ee   : > { %v1540_v46 = vsub.f32 %v4538_v2, %v1464_v44 }
 0x1f0   : > { %v1581_v51 = vmul.f32 1.442695, %v1540_v46  ;;  %v1579_v46 = vmul.f32 1.442695, %v1539_v53 }
 0x1f2   : > { %3835 = vpow2.f32 %v1581_v51 }
 0x1f5   : > { %v1467_v0 = vpop.xlane.xlu1 %1466 }
 0x1f6   : > { %v1541_v12 = vsub.f32 %v4542_v6, %v1467_v0 }
 0x1f8   : > { %v4638_v5 = vpop.eup %3835  ;;  %v1583_v22 = vmul.f32 1.442695, %v1541_v12  ;;  %1493 = vmax.xlane.f32.xlu0 %v1492_v4 }
 0x1f9   : > { %v1654_v2 = vsel %vm422_vm0, %v4638_v5, 0.0 }
 0x1fa   : > { %3837 = vpow2.f32 %v1583_v22  ;;  %3779 = vrot.lane.b32.xlu2 %v3778_v9, %s4079_s20  ;;  %1655 = vadd.xlane.f32.xlu1 %v1654_v2  ;;  %v1295_v9 = vpop.f32.mrf.mxu2  ;;  %v1327_v22 = vpop.f32.mrf.mxu3 }
 0x1fb   : > { %3839 = vpow2.f32 %v1573_v11  ;;  %v4673_v2 = vmul.f32 0.35355338, %v1295_v9  ;;  %v4685_v53 = vmul.f32 0.35355338, %v1327_v22 }
 0x1fd   : > { %v1470_v6 = vpop.xlane.xlu2 %1469 }
 0x1fe   : > { %v1542_v27 = vsub.f32 %v4546_v15, %v1470_v6 }
 0x200   : > { %v4651_v1 = vpop.eup %3837  ;;  %v1585_v24 = vmul.f32 1.442695, %v1542_v27  ;;  %1502 = vmax.xlane.f32.xlu0 %v1501_v61  ;;  %v3783_v61 = vpack.i.bf16 %v4327_v10, %v4334_v14  ;;  %v1513_v10 = vsel %vm422_vm0, %v4685_v53, -inf }
 0x201   : > { %v1657_v34 = vsel %vm422_vm0, %v4651_v1, 0.0  ;;  %v4655_v37 = vpop.eup %3839 }
 0x202   : > { %3841 = vpow2.f32 %v1585_v24  ;;  %1658 = vadd.xlane.f32.xlu1 %v1657_v34  ;;  %v1642_v15 = vsel %vm422_vm0, %v4655_v37, 0.0 }
 0x203   : > { %3843 = vpow2.f32 %v1577_v59 }
 0x204   : > { %3845 = vpow2.f32 %v1579_v46 }
 0x205   : > { %v1473_v56 = vpop.xlane.xlu2 %1472 }
 0x206   : > { %v1543_v60 = vsub.f32 %v4550_v21, %v1473_v56  ;;  %v1510_v21 = vsel %vm422_vm0, %v4673_v2, -inf }
 0x208   : > { %v4660_v43 = vpop.eup %3841  ;;  %1643 = vadd.xlane.f32.xlu0 %v1642_v15  ;;  %v1587_v50 = vmul.f32 1.442695, %v1543_v60  ;;  %v1330_v15 = vpop.f32.mrf.mxu3 }
 0x209   : > { %v1660_v44 = vsel %vm422_vm0, %v4660_v43, 0.0  ;;  %v4664_v51 = vpop.eup %3843 }
 0x20a   : > { %1661 = vadd.xlane.f32.xlu1 %v1660_v44  ;;  %v1648_v0 = vsel %vm422_vm0, %v4664_v51, 0.0  ;;  %v4669_v36 = vpop.eup %3845  ;;  %3847 = vpow2.f32 %v1587_v50 }
 0x20b   : > { %v1651_v4 = vsel %vm422_vm0, %v4669_v36, 0.0 }
 0x20d   : > { %v1476_v12 = vpop.xlane.xlu1 %1475 }
 0x20e   : > { %v1544_v26 = vsub.f32 %v4554_v25, %v1476_v12 }
 0x210   : > { %1649 = vadd.xlane.f32.xlu0 %v1648_v0  ;;  %v4676_v27 = vpop.eup %3847  ;;  %v1589_v34 = vmul.f32 1.442695, %v1544_v26  ;;  %v4692_v0 = vmul.f32 0.35355338, %v1330_v15 }
 0x211   : > { %v1663_v59 = vsel %vm422_vm0, %v4676_v27, 0.0 }
 0x212   : > { %3849 = vpow2.f32 %v1589_v34 }
 0x215   : > { %v1485_v11 = vpop.xlane.xlu0 %1484  ;;  %v1479_v25 = vpop.xlane.xlu2 %1478 }
 0x216   : > { %v1547_v24 = vsub.f32 %v4560_v33, %v1485_v11  ;;  %v1516_v33 = vsel %vm422_vm0, %v4692_v0, -inf }
 0x218   : > { %1652 = vadd.xlane.f32.xlu0 %v1651_v4  ;;  %v1595_v44 = vmul.f32 1.442695, %v1547_v24  ;;  %v4699_v60 = vpop.eup %3849 }
 0x21a   : > { %3851 = vpow2.f32 %v1595_v44 }
 0x21d   : > { %v1482_v6 = vpop.xlane.xlu1 %1481 }
 0x21e   : > { %v1546_v14 = vsub.f32 %v4566_v41, %v1482_v6  ;;  %v1666_v41 = vsel %vm422_vm0, %v4699_v60, 0.0 }
 0x220   : > { %1511 = vmax.xlane.f32.xlu0 %v1510_v21  ;;  %v1593_v50 = vmul.f32 1.442695, %v1546_v14  ;;  %v4706_v22 = vpop.eup %3851  ;;  %v1545_v14 = vsub.f32 %v4558_v31, %v1479_v25 }
 0x221   : > { %v1675_v11 = vsel %vm422_vm0, %v4706_v22, 0.0 }
 0x223   : > { %1664 = vadd.xlane.f32.xlu2 %v1663_v59  ;;  %3784 = vrot.lane.b32.xlu1 %v3783_v61, %s4079_s20 }
 0x225   : > { %v4688_v46 = vpop.xlane.xlu0 %1496  ;;  %v4690_v56 = vpop.xlane.xlu1 %1487 }
 0x228   : > { %1514 = vmax.xlane.f32.xlu0 %v1513_v10 }
 0x22b   : > { %1517 = vmax.xlane.f32.xlu2 %v1516_v33 }
 0x22d   : > { %v4701_v12 = vpop.xlane.xlu0 %1631  ;;  %v4703_v4 = vpop.xlane.xlu2 %1499 }
 0x22e   : > { %3853 = vrcp.f32 %v4701_v12  ;;  %v1629_v9 = vpop.xlane.xlu1 %1628  ;;  %vm1743_vm6 = vweird.f32 %v4701_v12 }
 0x22f   : > { %3855 = vrcp.f32 %v1629_v9  ;;  %v1732_v33 = vand.u32 2147483647, %v1629_v9  ;;  %vm1728_vm2 = vweird.f32 %v1629_v9 }
 0x230   : > { %1667 = vadd.xlane.f32.xlu0 %v1666_v41  ;;  %3857 = vpow2.f32 %v1593_v50  ;;  %v1734_v50 = vand.u32 2147483648, %v1629_v9 }
 0x231   : > { %vm1733_vm4 = vcmp.eq.f32.partialorder %v1732_v33, 8.507059e+37 }
 0x233   : > { %1676 = vadd.xlane.f32.xlu2 %v1675_v11 }
 0x234   : > { %v4712_v6 = vpop.eup %3853 }
 0x235   : > { %v3856_v26 = vpop.eup %3855  ;;  %v1739_v21 = vmul.f32 %v4712_v6, %v4701_v12  ;;  %v4716_v61 = vpop.xlane.xlu2 %1634  ;;  %vm1744_vm5 = vweird.f32 %v4712_v6 }
 0x236   : > { %v1724_v24 = vmul.f32 %v3856_v26, %v1629_v9  ;;  %3859 = vrcp.f32 %v4716_v61  ;;  %v1491_v34 = vpop.xlane.xlu1 %1490  ;;  %v4719_v59 = vpop.eup %3857  ;;  %vm1729_vm1 = vweird.f32 %v3856_v26  ;;  %vm4742_vm7 = vmor %vm1743_vm6, %vm1744_vm5  ;;  %vm1758_vm9 = vweird.f32 %v4716_v61 }
 0x237   : > { %v1740_v15 = vsub.f32 1.0, %v1739_v21  ;;  %v1549_v44 = vsub.f32 %v4597_v35, %v1491_v34  ;;  %v1672_v13 = vsel %vm422_vm0, %v4719_v59, 0.0  ;;  %v1591_v21 = vmul.f32 1.442695, %v1545_v14  ;;  %vm1730_vm3 = vmor %vm1728_vm2, %vm1729_vm1 }
 0x238   : > { %v1725_v10 = vsub.f32 1.0, %v1724_v24  ;;  %v1735_v35 = vor.u32 1.1754944e-38, %v1734_v50  ;;  %v1764_v14 = vand.u32 2147483648, %v4716_v61  ;;  %v3767_v50 = vunpack.i.h.bf16 %v4595_v30 }
 0x239   : > { %v1599_v41 = vmul.f32 1.442695, %v1549_v44  ;;  %v1741_v11 = vmul.f32 %v4712_v6, %v1740_v15  ;;  %v1747_v44 = vand.u32 2147483647, %v4701_v12 }
 0x23a   : > { %v1726_v8 = vmul.f32 %v3856_v26, %v1725_v10 }
 0x23b   : > { %3861 = vpow2.f32 %v1599_v41  ;;  %1673 = vadd.xlane.f32.xlu2 %v1672_v13  ;;  %v1742_v24 = vadd.f32 %v4712_v6, %v1741_v11  ;;  %v3788_v13 = vpack.i.bf16 %v4340_v18, %v4347_v23  ;;  %v1762_v23 = vand.u32 2147483647, %v4716_v61 }
 0x23c   : > { %v3860_v3 = vpop.eup %3859  ;;  %v1727_v7 = vadd.f32 %v3856_v26, %v1726_v8  ;;  %v1749_v8 = vand.u32 2147483648, %v4701_v12  ;;  %v1548_v41 = vsub.f32 %v4571_v47, %v4690_v56  ;;  %vm1748_vm10 = vcmp.eq.f32.partialorder %v1747_v44, 8.507059e+37 }
 0x23d   : > { %v1754_v31 = vmul.f32 %v3860_v3, %v4716_v61  ;;  %v4727_v25 = vpop.xlane.xlu2 %1637  ;;  %vm1759_vm8 = vweird.f32 %v3860_v3  ;;  %v1746_v12 = vsel %vm4742_vm7, %v4712_v6, %v1742_v24  ;;  %vm1763_vm12 = vcmp.eq.f32.partialorder %v1762_v23, 8.507059e+37 }
 0x23e   : > { %v1731_v34 = vsel %vm1730_vm3, %v3856_v26, %v1727_v7  ;;  %3863 = vrcp.f32 %v4727_v25  ;;  %v3766_v7 = vunpack.i.l.bf16 %v4595_v30  ;;  %v1750_v11 = vor.u32 1.1754944e-38, %v1749_v8  ;;  %vm1760_vm11 = vmor %vm1758_vm9, %vm1759_vm8 }
 0x23f   : > { %v1736_v9 = vsel %vm1733_vm4, %v1735_v35, %v1731_v34  ;;  %v1755_v15 = vsub.f32 1.0, %v1754_v31  ;;  %3865 = vpow2.f32 %v1591_v21  ;;  %v1765_v21 = vor.u32 1.1754944e-38, %v1764_v14 }
 0x240   : > { %v1737_v10 = vmul.f32 %v4583_v16, %v1736_v9  ;;  %v1751_v47 = vsel %vm1748_vm10, %v1750_v11, %v1746_v12  ;;  %v1597_v34 = vmul.f32 1.442695, %v1548_v41  ;;  %v1779_v44 = vand.u32 2147483648, %v4727_v25 }
 0x241   : > { %v4739_v33 = vpop.eup %3861  ;;  %v1756_v18 = vmul.f32 %v3860_v3, %v1755_v15  ;;  %v3771_v15 = vunpack.i.l.bf16 %v4573_v48  ;;  %v3772_v14 = vunpack.i.h.bf16 %v4573_v48  ;;  %vm1773_vm14 = vweird.f32 %v4727_v25 }
 0x242   : > { %3594 = vmatmul.msk.f32.vlgmr.msrb.gmra.mxu2 %vm422_vm0, %v1737_v10  ;;  %v1681_v16 = vsel %vm422_vm0, %v4739_v33, 0.0  ;;  %v1777_v10 = vand.u32 2147483647, %v4727_v25 }
 0x243   : > { %v1757_v35 = vadd.f32 %v3860_v3, %v1756_v18  ;;  %2369 = vmatpush.msrb.mxu2 %v3766_v7  ;;  %1682 = vadd.xlane.f32.xlu2 %v1681_v16  ;;  %v4769_v7 = vpop.f32.mrf.mxu2 }
 0x244   : > { %v3864_v30 = vpop.eup %3863  ;;  %3789 = vrot.lane.b32.xlu0 %v3788_v13, %s4079_s20  ;;  %vm1778_vm1 = vcmp.eq.f32.partialorder %v1777_v10, 8.507059e+37  ;;  %v1506_v10 = vpop.xlane.xlu1 %1505 }
 0x245   : > { %v1761_v31 = vsel %vm1760_vm11, %v3860_v3, %v1757_v35  ;;  %v1769_v6 = vmul.f32 %v3864_v30, %v4727_v25  ;;  %2370 = vmatpush.msrb.mxu2 %v3767_v50  ;;  %v1641_v24 = vpop.xlane.xlu2 %1640  ;;  %v4761_v9 = vpop.eup %3865  ;;  %v1752_v3 = vmul.f32 %v4587_v20, %v1751_v47  ;;  %vm1774_vm13 = vweird.f32 %v3864_v30 }
 0x246   : > { %v1766_v56 = vsel %vm1763_vm12, %v1765_v21, %v1761_v31  ;;  %3867 = vrcp.f32 %v1641_v24  ;;  %vm1775_vm15 = vmor %vm1773_vm14, %vm1774_vm13  ;;  %v1780_v20 = vor.u32 1.1754944e-38, %v1779_v44  ;;  %v1669_v18 = vsel %vm422_vm0, %v4761_v9, 0.0  ;;  %v3775_v47 = vpop.permute.xlu0 %3774 }
 0x247   : > { %v1767_v61 = vmul.f32 %v4600_v40, %v1766_v56  ;;  %v1770_v8 = vsub.f32 1.0, %v1769_v6  ;;  %3869 = vpow2.f32 %v1597_v34  ;;  %v1794_v41 = vand.u32 2147483648, %v1641_v24 }
 0x248   : > { %v1792_v25 = vand.u32 2147483647, %v1641_v24  ;;  %vm1788_vm3 = vweird.f32 %v1641_v24  ;;  %v3777_v44 = vunpack.i.h.bf16 %v3775_v47 }
 0x249   : > { %v1771_v13 = vmul.f32 %v3864_v30, %v1770_v8  ;;  %3596 = vmatmul.msk.f32.vlgmr.msrb.gmra.mxu3 %vm422_vm0, %v1767_v61  ;;  %v1795_v6 = vor.u32 1.1754944e-38, %v1794_v41 }
 0x24a   : > { %3595 = vmatmul.msk.f32.gmra.mxu2 %vm422_vm0, %v1752_v3  ;;  %2404 = vmatpush.msrb.mxu3 %v3771_v15  ;;  %vm1793_vm5 = vcmp.eq.f32.partialorder %v1792_v25, 8.507059e+37  ;;  %v3776_v15 = vunpack.i.l.bf16 %v3775_v47  ;;  %v1551_v3 = vsub.f32 %v4576_v62, %v4688_v46 }
 0x24b   : > { %v1772_v40 = vadd.f32 %v3864_v30, %v1771_v13  ;;  %v1365_v31 = vpop.f32.mrf.mxu2 }
 0x24c   : > { %v3868_v26 = vpop.eup %3867  ;;  %2405 = vmatpush.msrb.mxu3 %v3772_v14  ;;  %v4782_v8 = vmul.f32 0.35355338, %v1365_v31  ;;  %v1397_v14 = vpop.f32.mrf.mxu3  ;;  %v4800_v31 = vmul.f32 0.35355338, %v4769_v7 }
 0x24d   : > { %v1784_v23 = vmul.f32 %v3868_v26, %v1641_v24  ;;  %1670 = vadd.xlane.f32.xlu1 %v1669_v18  ;;  %v1776_v48 = vsel %vm1775_vm15, %v3864_v30, %v1772_v40  ;;  %v4776_v11 = vpop.eup %3869  ;;  %vm1789_vm2 = vweird.f32 %v3868_v26  ;;  %v3793_v24 = vpack.i.bf16 %v4353_v28, %v4360_v32 }
 0x24e   : > { %v1781_v50 = vsel %vm1778_vm1, %v1780_v20, %v1776_v48  ;;  %vm1790_vm4 = vmor %vm1788_vm3, %vm1789_vm2  ;;  %v1678_v30 = vsel %vm422_vm0, %v4776_v11, 0.0  ;;  %v4792_v32 = vmul.f32 0.35355338, %v1397_v14 }
 0x24f   : > { %v1785_v16 = vsub.f32 1.0, %v1784_v23  ;;  %v1782_v12 = vmul.f32 %v4609_v29, %v1781_v50 }
 0x250   : > { %v1525_v48 = vsel %vm422_vm0, %v4792_v32, -inf }
 0x251   : > { %v1786_v35 = vmul.f32 %v3868_v26, %v1785_v16  ;;  %3597 = vmatmul.msk.f32.gmra.mxu3 %vm422_vm0, %v1782_v12  ;;  %v1509_v12 = vpop.xlane.xlu1 %1508 }
 0x253   : > { %v1787_v21 = vadd.f32 %v3868_v26, %v1786_v35 }
 0x255   : > { %v1791_v56 = vsel %vm1790_vm4, %v3868_v26, %v1787_v21  ;;  %v1647_v29 = vpop.xlane.xlu2 %1646  ;;  %1679 = vadd.xlane.f32.xlu1 %v1678_v30  ;;  %v1603_v26 = vmul.f32 1.442695, %v1551_v3  ;;  %v1554_v30 = vsub.f32 %v4607_v57, %v1506_v10  ;;  %v1552_v57 = vsub.f32 %v4585_v19, %v4703_v4 }
 0x256   : > { %v1796_v34 = vsel %vm1793_vm5, %v1795_v6, %v1791_v56  ;;  %3871 = vrcp.f32 %v1647_v29  ;;  %v1824_v20 = vand.u32 2147483648, %v1647_v29  ;;  %v1822_v23 = vand.u32 2147483647, %v1647_v29 }
 0x257   : > { %v1797_v61 = vmul.f32 %v4620_v17, %v1796_v34  ;;  %v1522_v17 = vsel %vm422_vm0, %v4782_v8, -inf  ;;  %3873 = vpow2.f32 %v1603_v26  ;;  %vm1818_vm7 = vweird.f32 %v1647_v29 }
 0x258   : > { %v1825_v46 = vor.u32 1.1754944e-38, %v1824_v20  ;;  %vm1823_vm9 = vcmp.eq.f32.partialorder %v1822_v23, 8.507059e+37  ;;  %v1519_v34 = vsel %vm422_vm0, %v4800_v31, -inf }
 0x259   : > { %3598 = vmatmul.msk.f32.vlgmr.msra.gmra.mxu2 %vm422_vm0, %v1797_v61 }
 0x25a   : > { %2439 = vmatpush.msra.mxu2 %v3776_v15  ;;  %v1609_v15 = vmul.f32 1.442695, %v1554_v30 }
 0x25b   : > { %3794 = vrot.lane.b32.xlu2 %v3793_v24, %s4079_s20 }
 0x25c   : > { %v3872_v13 = vpop.eup %3871  ;;  %2440 = vmatpush.msra.mxu2 %v3777_v44 }
 0x25d   : > { %v1814_v40 = vmul.f32 %v3872_v13, %v1647_v29  ;;  %1523 = vmax.xlane.f32.xlu1 %v1522_v17  ;;  %vm1819_vm6 = vweird.f32 %v3872_v13  ;;  %v3780_v16 = vpop.permute.xlu2 %3779  ;;  %v4797_v21 = vpop.eup %3873 }
 0x25e   : > { %vm1820_vm8 = vmor %vm1818_vm7, %vm1819_vm6  ;;  %v3781_v25 = vunpack.i.l.bf16 %v3780_v16  ;;  %v3782_v6 = vunpack.i.h.bf16 %v3780_v16  ;;  %v1687_v29 = vsel %vm422_vm0, %v4797_v21, 0.0 }
 0x25f   : > { %v1815_v28 = vsub.f32 1.0, %v1814_v40 }
 0x261   : > { %v1816_v18 = vmul.f32 %v3872_v13, %v1815_v28 }
 0x263   : > { %v1817_v62 = vadd.f32 %v3872_v13, %v1816_v18  ;;  %v1555_v18 = vsub.f32 %v4618_v39, %v1509_v12 }
 0x265   : > { %v1821_v50 = vsel %vm1820_vm8, %v3872_v13, %v1817_v62  ;;  %1526 = vmax.xlane.f32.xlu1 %v1525_v48  ;;  %v1605_v13 = vmul.f32 1.442695, %v1552_v57  ;;  %v1611_v16 = vmul.f32 1.442695, %v1555_v18  ;;  %v3803_v18 = vpack.i.bf16 %v4384_v49, %v4392_v54 }
 0x266   : > { %v1826_v41 = vsel %vm1823_vm9, %v1825_v46, %v1821_v50 }
 0x267   : > { %v1827_v35 = vmul.f32 %v4627_v55, %v1826_v41  ;;  %v1400_v55 = vpop.f32.mrf.mxu3 }
 0x268   : > { %v4811_v24 = vmul.f32 0.35355338, %v1400_v55 }
 0x269   : > { %3600 = vmatmul.msk.f32.vlgmr.msra.gmra.mxu3 %vm422_vm0, %v1827_v35 }
 0x26a   : > { %2474 = vmatpush.msra.mxu3 %v3781_v25  ;;  %v1528_v44 = vsel %vm422_vm0, %v4811_v24, -inf }
 0x26b   : > { %v1494_v47 = vpop.xlane.xlu0 %1493 }
 0x26c   : > { %2475 = vmatpush.msra.mxu3 %v3782_v6  ;;  %v1550_v56 = vsub.f32 %v4632_v52, %v1494_v47 }
 0x26d   : > { %1688 = vadd.xlane.f32.xlu1 %v1687_v29  ;;  %v4809_v61 = vpop.xlane.xlu1 %1655 }
 0x26e   : > { %v1601_v7 = vmul.f32 1.442695, %v1550_v56  ;;  %1520 = vmax.xlane.f32.xlu0 %v1519_v34  ;;  %v3798_v56 = vpack.i.bf16 %v4370_v38, %v4377_v45  ;;  %vm1863_vm7 = vweird.f32 %v4809_v61 }
 0x270   : > { %3875 = vpow2.f32 %v1601_v7 }
 0x271   : > { %3877 = vpow2.f32 %v1609_v15 }
 0x272   : > { %3879 = vpow2.f32 %v1605_v13 }
 0x273   : > { %v1503_v52 = vpop.xlane.xlu0 %1502 }
 0x274   : > { %v1553_v19 = vsub.f32 %v4645_v42, %v1503_v52 }
 0x275   : > { %1529 = vmax.xlane.f32.xlu1 %v1528_v44  ;;  %v4821_v17 = vpop.xlane.xlu1 %1658 }
 0x276   : > { %v4817_v3 = vpop.eup %3875  ;;  %v1607_v26 = vmul.f32 1.442695, %v1553_v19  ;;  %vm1878_vm4 = vweird.f32 %v4821_v17  ;;  %v1884_v49 = vand.u32 2147483648, %v4821_v17 }
 0x277   : > { %v1684_v10 = vsel %vm422_vm0, %v4817_v3, 0.0  ;;  %v4823_v14 = vpop.eup %3877 }
 0x278   : > { %1685 = vadd.xlane.f32.xlu0 %v1684_v10  ;;  %v1696_v40 = vsel %vm422_vm0, %v4823_v14, 0.0  ;;  %v4829_v28 = vpop.eup %3879 }
 0x279   : > { %v1690_v48 = vsel %vm422_vm0, %v4829_v28, 0.0 }
 0x27b   : > { %v1644_v4 = vpop.xlane.xlu0 %1643 }
 0x27c   : > { %3881 = vrcp.f32 %v1644_v4  ;;  %v1809_v41 = vand.u32 2147483648, %v1644_v4  ;;  %v1807_v25 = vand.u32 2147483647, %v1644_v4  ;;  %vm1803_vm11 = vweird.f32 %v1644_v4 }
 0x27d   : > { %3883 = vrcp.f32 %v4821_v17  ;;  %1697 = vadd.xlane.f32.xlu1 %v1696_v40  ;;  %v4832_v23 = vpop.xlane.xlu1 %1661 }
 0x27e   : > { %3885 = vpow2.f32 %v1607_v26  ;;  %v1810_v34 = vor.u32 1.1754944e-38, %v1809_v41  ;;  %vm1808_vm13 = vcmp.eq.f32.partialorder %v1807_v25, 8.507059e+37 }
 0x27f   : > { %3887 = vrcp.f32 %v4809_v61 }
 0x282   : > { %v3882_v20 = vpop.eup %3881 }
 0x283   : > { %v4834_v62 = vpop.eup %3883  ;;  %v1799_v42 = vmul.f32 %v3882_v20, %v1644_v4  ;;  %v1650_v46 = vpop.xlane.xlu0 %1649  ;;  %vm1804_vm10 = vweird.f32 %v3882_v20 }
 0x284   : > { %3889 = vrcp.f32 %v1650_v46  ;;  %1691 = vadd.xlane.f32.xlu2 %v1690_v48  ;;  %v1874_v39 = vmul.f32 %v4834_v62, %v4821_v17  ;;  %v4842_v35 = vpop.eup %3885  ;;  %vm1805_vm12 = vmor %vm1803_vm11, %vm1804_vm10  ;;  %v1839_v19 = vand.u32 2147483648, %v1650_v46  ;;  %v1837_v26 = vand.u32 2147483647, %v1650_v46 }
 0x285   : > { %v1800_v50 = vsub.f32 1.0, %v1799_v42  ;;  %3891 = vrcp.f32 %v4832_v23  ;;  %v4844_v6 = vpop.eup %3887  ;;  %v1693_v57 = vsel %vm422_vm0, %v4842_v35, 0.0  ;;  %vm1833_vm15 = vweird.f32 %v1650_v46 }
 0x286   : > { %3893 = vpow2.f32 %v1611_v16  ;;  %v1875_v29 = vsub.f32 1.0, %v1874_v39  ;;  %v1859_v38 = vmul.f32 %v4844_v6, %v4809_v61  ;;  %vm1879_vm1 = vweird.f32 %v4834_v62 }
 0x287   : > { %v1801_v12 = vmul.f32 %v3882_v20, %v1800_v50  ;;  %vm1838_vm3 = vcmp.eq.f32.partialorder %v1837_v26, 8.507059e+37  ;;  %vm4879_vm5 = vmor %vm1878_vm4, %vm1879_vm1  ;;  %vm1864_vm10 = vweird.f32 %v4844_v6 }
 0x288   : > { %v1876_v13 = vmul.f32 %v4834_v62, %v1875_v29  ;;  %v1860_v42 = vsub.f32 1.0, %v1859_v38 }
 0x289   : > { %v1802_v30 = vadd.f32 %v3882_v20, %v1801_v12 }
 0x28a   : > { %v3890_v47 = vpop.eup %3889  ;;  %v1877_v16 = vadd.f32 %v4834_v62, %v1876_v13 }
 0x28b   : > { %v4848_v55 = vpop.eup %3891  ;;  %v1829_v7 = vmul.f32 %v3890_v47, %v1650_v46  ;;  %v4850_v15 = vpop.xlane.xlu0 %1652  ;;  %v1806_v52 = vsel %vm1805_vm12, %v3882_v20, %v1802_v30  ;;  %vm1834_vm14 = vweird.f32 %v3890_v47 }
 0x28c   : > { %3895 = vrcp.f32 %v4850_v15  ;;  %3799 = vrot.lane.b32.xlu0 %v3798_v56, %s4079_s20  ;;  %1694 = vadd.xlane.f32.xlu2 %v1693_v57  ;;  %v1811_v44 = vsel %vm1808_vm13, %v1810_v34, %v1806_v52  ;;  %v1889_v10 = vmul.f32 %v4848_v55, %v4832_v23  ;;  %v4862_v20 = vpop.eup %3893  ;;  %vm1835_vm2 = vmor %vm1833_vm15, %vm1834_vm14  ;;  %v1861_v56 = vmul.f32 %v4844_v6, %v1860_v42 }
 0x28d   : > { %v1830_v45 = vsub.f32 1.0, %v1829_v7  ;;  %v1812_v4 = vmul.f32 %v4655_v37, %v1811_v44  ;;  %v1840_v37 = vor.u32 1.1754944e-38, %v1839_v19  ;;  %v1699_v25 = vsel %vm422_vm0, %v4862_v20, 0.0  ;;  %vm4911_vm14 = vmor %vm1863_vm7, %vm1864_vm10 }
 0x28e   : > { %v1890_v39 = vsub.f32 1.0, %v1889_v10  ;;  %v1854_v52 = vand.u32 2147483648, %v4850_v15  ;;  %v1852_v13 = vand.u32 2147483647, %v4850_v15  ;;  %vm1848_vm9 = vweird.f32 %v4850_v15 }
 0x28f   : > { %v1831_v40 = vmul.f32 %v3890_v47, %v1830_v45  ;;  %3599 = vmatmul.msk.f32.gmra.mxu2 %vm422_vm0, %v1812_v4  ;;  %v1862_v10 = vadd.f32 %v4844_v6, %v1861_v56  ;;  %vm1894_vm12 = vweird.f32 %v4848_v55  ;;  %vm1893_vm15 = vweird.f32 %v4832_v23 }
 0x290   : > { %v1891_v57 = vmul.f32 %v4848_v55, %v1890_v39  ;;  %v1855_v4 = vor.u32 1.1754944e-38, %v1854_v52  ;;  %vm1853_vm13 = vcmp.eq.f32.partialorder %v1852_v13, 8.507059e+37  ;;  %vm4923_vm1 = vmor %vm1893_vm15, %vm1894_vm12  ;;  %v2764_v13 = vld [vmem:[%s5469_s4 + $0x8] sm:$0xff] }
 0x291   : > { %v1832_v48 = vadd.f32 %v3890_v47, %v1831_v40  ;;  %2990 = vmatpush.msrb.mxu1 %v2764_v13 }
 0x292   : > { %v3896_v50 = vpop.eup %3895  ;;  %v1892_v40 = vadd.f32 %v4848_v55, %v1891_v57 }
 0x293   : > { %v1844_v12 = vmul.f32 %v3896_v50, %v4850_v15  ;;  %v1512_v41 = vpop.xlane.xlu0 %1511  ;;  %v1836_v30 = vsel %vm1835_vm2, %v3890_v47, %v1832_v48  ;;  %v1882_v47 = vand.u32 2147483647, %v4821_v17  ;;  %vm1849_vm6 = vweird.f32 %v3896_v50 }
 0x294   : > { %v1556_v54 = vsub.f32 %v4673_v2, %v1512_v41  ;;  %3804 = vrot.lane.b32.xlu0 %v3803_v18, %s4079_s20  ;;  %1700 = vadd.xlane.f32.xlu2 %v1699_v25  ;;  %v1841_v46 = vsel %vm1838_vm3, %v1840_v37, %v1836_v30  ;;  %v1881_v2 = vsel %vm4879_vm5, %v4834_v62, %v1877_v16  ;;  %v1869_v17 = vand.u32 2147483648, %v4809_v61  ;;  %vm1850_vm11 = vmor %vm1848_vm9, %vm1849_vm6 }
 0x295   : > { %v1845_v34 = vsub.f32 1.0, %v1844_v12  ;;  %v1842_v7 = vmul.f32 %v4664_v51, %v1841_v46  ;;  %v1885_v51 = vor.u32 1.1754944e-38, %v1884_v49  ;;  %vm1883_vm8 = vcmp.eq.f32.partialorder %v1882_v47, 8.507059e+37  ;;  %v3785_v18 = vpop.permute.xlu1 %3784 }
 0x296   : > { %v1613_v38 = vmul.f32 1.442695, %v1556_v54  ;;  %v4890_v45 = vpop.xlane.xlu2 %1664  ;;  %v1867_v48 = vand.u32 2147483647, %v4809_v61  ;;  %v1899_v16 = vand.u32 2147483648, %v4832_v23  ;;  %v3786_v61 = vunpack.i.l.bf16 %v3785_v18 }
 0x297   : > { %v1846_v44 = vmul.f32 %v3896_v50, %v1845_v34  ;;  %3897 = vrcp.f32 %v4890_v45  ;;  %3601 = vmatmul.msk.f32.gmra.mxu3 %vm422_vm0, %v1842_v7  ;;  %v1886_v19 = vsel %vm1883_vm8, %v1885_v51, %v1881_v2  ;;  %v1897_v41 = vand.u32 2147483647, %v4832_v23 }
 0x298   : > { %3899 = vpow2.f32 %v1613_v38  ;;  %v1866_v23 = vsel %vm4911_vm14, %v4844_v6, %v1862_v10  ;;  %v1896_v29 = vsel %vm4923_vm1, %v4848_v55, %v1892_v40  ;;  %v1900_v47 = vor.u32 1.1754944e-38, %v1899_v16  ;;  %v2765_v40 = vld [vmem:[%s5470_s5] sm:$0xff] }
 0x299   : > { %v1847_v62 = vadd.f32 %v3896_v50, %v1846_v44  ;;  %v3787_v34 = vunpack.i.h.bf16 %v3785_v18  ;;  %vm1868_vm2 = vcmp.eq.f32.partialorder %v1867_v48, 8.507059e+37  ;;  %vm1898_vm3 = vcmp.eq.f32.partialorder %v1897_v41, 8.507059e+37  ;;  %v2766_v44 = vld [vmem:[%s5470_s5 + $0x8] sm:$0xff]  ;;  %v3951_v18 = vld [vmem:[%s4194_s19] sm:$0xff] }
 0x29a   : > { %v1901_v52 = vsel %vm1898_vm3, %v1900_v47, %v1896_v29  ;;  %v1914_v55 = vand.u32 2147483648, %v4890_v45  ;;  %vm1908_vm5 = vweird.f32 %v4890_v45  ;;  %v1912_v51 = vand.u32 2147483647, %v4890_v45  ;;  %2877 = vmatpush.msrb.mxu0 %v2766_v44 }
 0x29b   : > { %v1851_v26 = vsel %vm1850_vm11, %v3896_v50, %v1847_v62  ;;  %v1515_v42 = vpop.xlane.xlu0 %1514  ;;  %v1887_v50 = vmul.f32 %v4651_v1, %v1886_v19  ;;  %v1902_v62 = vmul.f32 %v4660_v43, %v1901_v52 }
 0x29c   : > { %v1856_v15 = vsel %vm1853_vm13, %v1855_v4, %v1851_v26  ;;  %v1557_v39 = vsub.f32 %v4685_v53, %v1515_v42  ;;  %v1870_v53 = vor.u32 1.1754944e-38, %v1869_v17  ;;  %2878 = vmatpush.msrb.mxu0 %v2765_v40  ;;  %vm1913_vm7 = vcmp.eq.f32.partialorder %v1912_v51, 8.507059e+37 }
 0x29d   : > { %v4905_v37 = vpop.eup %3897  ;;  %v1857_v25 = vmul.f32 %v4669_v36, %v1856_v15 }
 0x29e   : > { %v4919_v30 = vpop.eup %3899  ;;  %v1904_v54 = vmul.f32 %v4905_v37, %v4890_v45  ;;  %v1615_v1 = vmul.f32 1.442695, %v1557_v39  ;;  %v1518_v46 = vpop.xlane.xlu2 %1517  ;;  %v1871_v57 = vsel %vm1868_vm2, %v1870_v53, %v1866_v23  ;;  %vm1909_vm4 = vweird.f32 %v4905_v37 }
 0x29f   : > { %v1558_v56 = vsub.f32 %v4692_v0, %v1518_v46  ;;  %3602 = vmatmul.msk.f32.vlgmr.msrb.gmra.mxu2 %vm422_vm0, %v1857_v25  ;;  %3604 = vmatmul.msk.f32.vlgmr.msrb.gmra.mxu3 %vm422_vm0, %v1887_v50  ;;  %v1702_v36 = vsel %vm422_vm0, %v4919_v30, 0.0  ;;  %v1872_v17 = vmul.f32 %v4638_v5, %v1871_v57  ;;  %vm4956_vm6 = vmor %vm1908_vm5, %vm1909_vm4  ;;  %v2763_v5 = vld [vmem:[%s5469_s4] sm:$0xff]  ;;  %v1915_v45 = vor.u32 1.1754944e-38, %v1914_v55  ;;  %v3952_v46 = vld [vmem:[%s4194_s19 + $0x8] sm:$0xff] }
 0x2a0   : > { %v1905_v7 = vsub.f32 1.0, %v1904_v54  ;;  %3901 = vpow2.f32 %v1615_v1  ;;  %2509 = vmatpush.msrb.mxu2 %v3786_v61  ;;  %1703 = vadd.xlane.f32.xlu1 %v1702_v36  ;;  %v3953_v55 = vld [vmem:[%s4194_s19 + $0x10] sm:$0xff] }
 0x2a1   : > { %v1617_v2 = vmul.f32 1.442695, %v1558_v56  ;;  %2991 = vmatpush.msrb.mxu1 %v2763_v5 }
 0x2a2   : > { %v1906_v0 = vmul.f32 %v4905_v37, %v1905_v7  ;;  %2510 = vmatpush.msrb.mxu2 %v3787_v34  ;;  %3658 = vmatmul.msk.f32.vlgmr.msrb.gmra.mxu1 %vm422_vm0, %v3951_v18 }
 0x2a3   : > { %v1668_v6 = vpop.xlane.xlu0 %1667 }
 0x2a4   : > { %v1907_v38 = vadd.f32 %v4905_v37, %v1906_v0  ;;  %3903 = vrcp.f32 %v1668_v6  ;;  %v1929_v50 = vand.u32 2147483648, %v1668_v6  ;;  %v1927_v49 = vand.u32 2147483647, %v1668_v6 }
 0x2a5   : > { %3905 = vpow2.f32 %v1617_v2  ;;  %vm1923_vm9 = vweird.f32 %v1668_v6 }
 0x2a6   : > { %v4954_v10 = vpop.eup %3901  ;;  %v1677_v4 = vpop.xlane.xlu2 %1676  ;;  %v1911_v43 = vsel %vm4956_vm6, %v4905_v37, %v1907_v38  ;;  %vm1928_vm11 = vcmp.eq.f32.partialorder %v1927_v49, 8.507059e+37 }
 0x2a7   : > { %3907 = vrcp.f32 %v1677_v4  ;;  %3603 = vmatmul.msk.f32.gmra.mxu2 %vm422_vm0, %v1872_v17  ;;  %3605 = vmatmul.msk.f32.gmra.mxu3 %vm422_vm0, %v1902_v62  ;;  %v1705_v26 = vsel %vm422_vm0, %v4954_v10, 0.0  ;;  %v1916_v48 = vsel %vm1913_vm7, %v1915_v45, %v1911_v43  ;;  %v1974_v29 = vand.u32 2147483648, %v1677_v4 }
 0x2a8   : > { %1706 = vadd.xlane.f32.xlu1 %v1705_v26  ;;  %v1917_v37 = vmul.f32 %v4676_v27, %v1916_v48  ;;  %v1930_v27 = vor.u32 1.1754944e-38, %v1929_v50  ;;  %vm1968_vm13 = vweird.f32 %v1677_v4  ;;  %v1972_v34 = vand.u32 2147483647, %v1677_v4  ;;  %v3955_v48 = vld [vmem:[%s4194_s19 + $0x20] sm:$0xff] }
 0x2a9   : > { %v3808_v45 = vpack.i.bf16 %v4399_v58, %v4415_v63 }
 0x2aa   : > { %v3904_v42 = vpop.eup %3903  ;;  %3659 = vmatmul.msk.f32.gmra.mxu1 %vm422_vm0, %v3952_v46  ;;  %vm1973_vm15 = vcmp.eq.f32.partialorder %v1972_v34, 8.507059e+37 }
 0x2ab   : > { %v1919_v16 = vmul.f32 %v3904_v42, %v1668_v6  ;;  %v4975_v15 = vpop.eup %3905  ;;  %vm1924_vm8 = vweird.f32 %v3904_v42  ;;  %v1975_v6 = vor.u32 1.1754944e-38, %v1974_v29  ;;  %v3956_v29 = vld [vmem:[%s4194_s19 + $0x28] sm:$0xff] }
 0x2ac   : > { %v1708_v54 = vsel %vm422_vm0, %v4975_v15, 0.0  ;;  %vm1925_vm10 = vmor %vm1923_vm9, %vm1924_vm8 }
 0x2ad   : > { %v3908_v39 = vpop.eup %3907  ;;  %v1920_v12 = vsub.f32 1.0, %v1919_v16 }
 0x2ae   : > { %v1964_v41 = vmul.f32 %v3908_v39, %v1677_v4  ;;  %v4978_v25 = vpop.xlane.xlu2 %1673  ;;  %vm1969_vm12 = vweird.f32 %v3908_v39  ;;  %v3954_v4 = vld [vmem:[%s4194_s19 + $0x18] sm:$0xff] }
 0x2af   : > { %v1921_v53 = vmul.f32 %v3904_v42, %v1920_v12  ;;  %3606 = vmatmul.msk.f32.vlgmr.msra.gmra.mxu2 %vm422_vm0, %v1917_v37  ;;  %vm1970_vm14 = vmor %vm1968_vm13, %vm1969_vm12  ;;  %3909 = vrcp.f32 %v4978_v25  ;;  %vm1953_vm6 = vweird.f32 %v4978_v25  ;;  %v1957_v34 = vand.u32 2147483647, %v4978_v25 }
 0x2b0   : > { %v1965_v61 = vsub.f32 1.0, %v1964_v41  ;;  %1709 = vadd.xlane.f32.xlu1 %v1708_v54 }
 0x2b1   : > { %v1922_v1 = vadd.f32 %v3904_v42, %v1921_v53  ;;  %vm1958_vm9 = vcmp.eq.f32.partialorder %v1957_v34, 8.507059e+37 }
 0x2b2   : > { %v1966_v56 = vmul.f32 %v3908_v39, %v1965_v61  ;;  %3660 = vmatmul.msk.f32.gmra.mxu1 %vm422_vm0, %v3953_v55 }
 0x2b3   : > { %v1926_v36 = vsel %vm1925_vm10, %v3904_v42, %v1922_v1 }
 0x2b4   : > { %v1967_v23 = vadd.f32 %v3908_v39, %v1966_v56  ;;  %v1931_v47 = vsel %vm1928_vm11, %v1930_v27, %v1926_v36  ;;  %v1959_v56 = vand.u32 2147483648, %v4978_v25 }
 0x2b5   : > { %v1932_v7 = vmul.f32 %v4699_v60, %v1931_v47  ;;  %v4994_v17 = vpop.eup %3909 }
 0x2b6   : > { %v3790_v0 = vpop.permute.xlu0 %3789  ;;  %v4986_v2 = vpop.xlane.xlu2 %1682  ;;  %v1971_v57 = vsel %vm1970_vm14, %v3908_v39, %v1967_v23  ;;  %v1949_v40 = vmul.f32 %v4994_v17, %v4978_v25  ;;  %vm1954_vm3 = vweird.f32 %v4994_v17 }
 0x2b7   : > { %v3791_v52 = vunpack.i.l.bf16 %v3790_v0  ;;  %3607 = vmatmul.msk.f32.gmra.mxu2 %vm422_vm0, %v1932_v7  ;;  %v3792_v38 = vunpack.i.h.bf16 %v3790_v0  ;;  %v1976_v44 = vsel %vm1973_vm15, %v1975_v6, %v1971_v57  ;;  %vm5020_vm7 = vmor %vm1953_vm6, %vm1954_vm3  ;;  %vm1998_vm14 = vweird.f32 %v4986_v2 }
 0x2b8   : > { %v1977_v60 = vmul.f32 %v4706_v22, %v1976_v44  ;;  %v1950_v43 = vsub.f32 1.0, %v1949_v40 }
 0x2b9   : > { %2544 = vmatpush.msrb.mxu3 %v3791_v52 }
 0x2ba   : > { %3661 = vmatmul.msk.f32.gmra.mxu1 %vm422_vm0, %v3954_v4  ;;  %v1951_v39 = vmul.f32 %v4994_v17, %v1950_v43 }
 0x2bb   : > { %2545 = vmatpush.msrb.mxu3 %v3792_v38 }
 0x2bc   : > { %v1952_v49 = vadd.f32 %v4994_v17, %v1951_v39 }
 0x2be   : > { %v3795_v13 = vpop.permute.xlu2 %3794  ;;  %v1956_v38 = vsel %vm5020_vm7, %v4994_v17, %v1952_v49 }
 0x2bf   : > { %v3796_v51 = vunpack.i.l.bf16 %v3795_v13  ;;  %3610 = vmatmul.msk.f32.vlgmr.msrb.gmra.mxu2 %vm422_vm0, %v1977_v60  ;;  %v3797_v19 = vunpack.i.h.bf16 %v3795_v13  ;;  %v1960_v60 = vor.u32 1.1754944e-38, %v1959_v56 }
 0x2c0   : > { %v1671_v62 = vpop.xlane.xlu1 %1670 }
 0x2c1   : > { %3911 = vrcp.f32 %v1671_v62  ;;  %2579 = vmatpush.msra.mxu2 %v3796_v51  ;;  %v1944_v37 = vand.u32 2147483648, %v1671_v62  ;;  %v1942_v58 = vand.u32 2147483647, %v1671_v62  ;;  %vm1938_vm2 = vweird.f32 %v1671_v62 }
 0x2c2   : > { %3913 = vrcp.f32 %v4986_v2  ;;  %3662 = vmatmul.msk.f32.gmra.mxu1 %vm422_vm0, %v3955_v48  ;;  %v1961_v13 = vsel %vm1958_vm9, %v1960_v60, %v1956_v38 }
 0x2c3   : > { %2580 = vmatpush.msra.mxu2 %v3797_v19  ;;  %v1945_v61 = vor.u32 1.1754944e-38, %v1944_v37  ;;  %vm1943_vm5 = vcmp.eq.f32.partialorder %v1942_v58, 8.507059e+37  ;;  %v2004_v19 = vand.u32 2147483648, %v4986_v2  ;;  %v1962_v43 = vmul.f32 %v4719_v59, %v1961_v13  ;;  %v3958_v37 = vld [vmem:[%s4194_s19 + $0x38] sm:$0xff] }
 0x2c5   : > { %v2232_v22 = vpop.f32.mrf.mxu2 }
 0x2c6   : > { %3626 = vmatmul.msk.f32.vlgmr.msrb.gmra.mxu0 %vm422_vm0, %v2232_v22  ;;  %v3957_v22 = vld [vmem:[%s4194_s19 + $0x30] sm:$0xff] }
 0x2c7   : > { %v3912_v5 = vpop.eup %3911 }
 0x2c8   : > { %v1934_v26 = vmul.f32 %v3912_v5, %v1671_v62  ;;  %v1680_v18 = vpop.xlane.xlu1 %1679  ;;  %v5004_v42 = vpop.eup %3913  ;;  %vm1939_vm1 = vweird.f32 %v3912_v5 }
 0x2c9   : > { %3915 = vrcp.f32 %v1680_v18  ;;  %3809 = vrot.lane.b32.xlu1 %v3808_v45, %s4079_s20  ;;  %v1994_v12 = vmul.f32 %v5004_v42, %v4986_v2  ;;  %vm1940_vm4 = vmor %vm1938_vm2, %vm1939_vm1  ;;  %v1989_v57 = vand.u32 2147483648, %v1680_v18  ;;  %v1987_v44 = vand.u32 2147483647, %v1680_v18 }
 0x2ca   : > { %v1935_v16 = vsub.f32 1.0, %v1934_v26  ;;  %3663 = vmatmul.msk.f32.gmra.mxu1 %vm422_vm0, %v3956_v29  ;;  %vm1983_vm10 = vweird.f32 %v1680_v18  ;;  %vm1999_vm12 = vweird.f32 %v5004_v42 }
 0x2cb   : > { %v1995_v54 = vsub.f32 1.0, %v1994_v12  ;;  %v1990_v25 = vor.u32 1.1754944e-38, %v1989_v57  ;;  %vm1988_vm13 = vcmp.eq.f32.partialorder %v1987_v44, 8.507059e+37  ;;  %vm2000_vm15 = vmor %vm1998_vm14, %vm1999_vm12 }
 0x2cc   : > { %v1936_v50 = vmul.f32 %v3912_v5, %v1935_v16  ;;  %v2267_v52 = vpop.f32.mrf.mxu3  ;;  %v2005_v16 = vor.u32 1.1754944e-38, %v2004_v19  ;;  %v5499_v19 = vld [vmem:[#allocation8_spill] sm:$0xff] }
 0x2cd   : > { %v2235_v63 = vpop.f32.mrf.mxu2 }
 0x2ce   : > { %v1937_v41 = vadd.f32 %v3912_v5, %v1936_v50  ;;  %3627 = vmatmul.msk.f32.gmra.mxu0 %vm422_vm0, %v2235_v63 }
 0x2cf   : > { %v3916_v53 = vpop.eup %3915 }
 0x2d0   : > { %v1941_v1 = vsel %vm1940_vm4, %v3912_v5, %v1937_v41  ;;  %v1979_v46 = vmul.f32 %v3916_v53, %v1680_v18  ;;  %v1524_v27 = vpop.xlane.xlu1 %1523  ;;  %vm1984_vm8 = vweird.f32 %v3916_v53  ;;  %v2002_v5 = vand.u32 2147483647, %v4986_v2 }
 0x2d1   : > { %v1946_v36 = vsel %vm1943_vm5, %v1945_v61, %v1941_v1  ;;  %v1560_v23 = vsub.f32 %v4782_v8, %v1524_v27  ;;  %v1996_v8 = vmul.f32 %v5004_v42, %v1995_v54  ;;  %vm1985_vm11 = vmor %vm1983_vm10, %vm1984_vm8  ;;  %v3959_v54 = vld [vmem:[%s4194_s19 + $0x40] sm:$0xff] }
 0x2d2   : > { %v1947_v7 = vmul.f32 %v4761_v9, %v1946_v36  ;;  %v1980_v0 = vsub.f32 1.0, %v1979_v46  ;;  %3664 = vmatmul.msk.f32.gmra.mxu1 %vm422_vm0, %v3957_v22  ;;  %vm2003_vm1 = vcmp.eq.f32.partialorder %v2002_v5, 8.507059e+37 }
 0x2d3   : > { %v1621_v6 = vmul.f32 1.442695, %v1560_v23  ;;  %v1997_v51 = vadd.f32 %v5004_v42, %v1996_v8 }
 0x2d4   : > { %v1981_v55 = vmul.f32 %v3916_v53, %v1980_v0  ;;  %3608 = vmatmul.msk.f32.vlgmr.msra.gmra.mxu3 %vm422_vm0, %v1947_v7  ;;  %v2270_v2 = vpop.f32.mrf.mxu3  ;;  %v3960_v0 = vld [vmem:[%s4194_s19 + $0x48] sm:$0xff] }
 0x2d5   : > { %3917 = vpow2.f32 %v1621_v6  ;;  %v2001_v48 = vsel %vm2000_vm15, %v5004_v42, %v1997_v51  ;;  %v3961_v51 = vld [vmem:[%s4194_s19 + $0x50] sm:$0xff] }
 0x2d6   : > { %v1982_v9 = vadd.f32 %v3916_v53, %v1981_v55  ;;  %3628 = vmatmul.msk.f32.gmra.mxu0 %vm422_vm0, %v2267_v52  ;;  %v2006_v59 = vsel %vm2003_vm1, %v2005_v16, %v2001_v48 }
 0x2d7   : > { %v2007_v42 = vmul.f32 %v4739_v33, %v2006_v59  ;;  %v5501_v59 = vld [vmem:[#allocation10_spill] sm:$0xff] }
 0x2d8   : > { %v1527_v17 = vpop.xlane.xlu1 %1526  ;;  %v1986_v62 = vsel %vm1985_vm11, %v3916_v53, %v1982_v9 }
 0x2d9   : > { %v1561_v4 = vsub.f32 %v4792_v32, %v1527_v17  ;;  %v1991_v40 = vsel %vm1988_vm13, %v1990_v25, %v1986_v62  ;;  %v5498_v62 = vld [vmem:[#allocation9_spill] sm:$0xff] }
 0x2da   : > { %v1992_v45 = vmul.f32 %v4776_v11, %v1991_v40  ;;  %3665 = vmatmul.msk.f32.gmra.mxu1 %vm422_vm0, %v3958_v37 }
 0x2db   : > { %v5042_v26 = vpop.eup %3917  ;;  %v1623_v18 = vmul.f32 1.442695, %v1561_v4  ;;  %v3813_v4 = vpack.i.bf16 %v5499_v19, %v5498_v62 }
 0x2dc   : > { %3609 = vmatmul.msk.f32.gmra.mxu3 %vm422_vm0, %v1962_v43  ;;  %3611 = vmatmul.msk.f32.gmra.mxu2 %vm422_vm0, %v1992_v45  ;;  %v1714_v32 = vsel %vm422_vm0, %v5042_v26, 0.0  ;;  %v2302_v41 = vpop.f32.mrf.mxu2 }
 0x2dd   : > { %3919 = vpow2.f32 %v1623_v18  ;;  %1715 = vadd.xlane.f32.xlu2 %v1714_v32 }
 0x2de   : > { %3629 = vmatmul.msk.f32.gmra.mxu0 %vm422_vm0, %v2270_v2  ;;  %v5500_v2 = vld [vmem:[#allocation11_spill] sm:$0xff] }
 0x2e0   : > { %v1689_v11 = vpop.xlane.xlu1 %1688 }
 0x2e1   : > { %3921 = vrcp.f32 %v1689_v11  ;;  %v1521_v39 = vpop.xlane.xlu0 %1520  ;;  %v2034_v1 = vand.u32 2147483648, %v1689_v11  ;;  %v2032_v23 = vand.u32 2147483647, %v1689_v11  ;;  %vm2028_vm3 = vweird.f32 %v1689_v11 }
 0x2e2   : > { %v1559_v12 = vsub.f32 %v4800_v31, %v1521_v39  ;;  %3666 = vmatmul.msk.f32.gmra.mxu1 %vm422_vm0, %v3959_v54 }
 0x2e3   : > { %v5054_v50 = vpop.eup %3919  ;;  %vm2033_vm5 = vcmp.eq.f32.partialorder %v2032_v23, 8.507059e+37  ;;  %v3963_v23 = vld [vmem:[%s4194_s19 + $0x60] sm:$0xff] }
 0x2e4   : > { %v1619_v58 = vmul.f32 1.442695, %v1559_v12  ;;  %3612 = vmatmul.msk.f32.vlgmr.msrb.gmra.mxu3 %vm422_vm0, %v2007_v42  ;;  %v1717_v63 = vsel %vm422_vm0, %v5054_v50, 0.0  ;;  %v3962_v42 = vld [vmem:[%s4194_s19 + $0x58] sm:$0xff] }
 0x2e5   : > { %1718 = vadd.xlane.f32.xlu2 %v1717_v63 }
 0x2e6   : > { %3923 = vpow2.f32 %v1619_v58  ;;  %3630 = vmatmul.msk.f32.gmra.mxu0 %vm422_vm0, %v2302_v41 }
 0x2e7   : > { %v3922_v53 = vpop.eup %3921 }
 0x2e8   : > { %v2024_v49 = vmul.f32 %v3922_v53, %v1689_v11  ;;  %v1530_v61 = vpop.xlane.xlu1 %1529  ;;  %vm2029_vm2 = vweird.f32 %v3922_v53  ;;  %v3818_v11 = vpack.i.bf16 %v5501_v59, %v5500_v2  ;;  %v3965_v59 = vld [vmem:[%s4194_s19 + $0x70] sm:$0xff] }
 0x2e9   : > { %v1562_v33 = vsub.f32 %v4811_v24, %v1530_v61  ;;  %vm2030_vm4 = vmor %vm2028_vm3, %vm2029_vm2  ;;  %v2035_v24 = vor.u32 1.1754944e-38, %v2034_v1 }
 0x2ea   : > { %v2025_v31 = vsub.f32 1.0, %v2024_v49  ;;  %3667 = vmatmul.msk.f32.gmra.mxu1 %vm422_vm0, %v3960_v0 }
 0x2eb   : > { %v1625_v46 = vmul.f32 1.442695, %v1562_v33  ;;  %v1686_v27 = vpop.xlane.xlu0 %1685 }
 0x2ec   : > { %v5063_v56 = vpop.eup %3923  ;;  %v2026_v36 = vmul.f32 %v3922_v53, %v2025_v31  ;;  %3925 = vrcp.f32 %v1686_v27  ;;  %v2019_v44 = vand.u32 2147483648, %v1686_v27  ;;  %v2017_v25 = vand.u32 2147483647, %v1686_v27 }
 0x2ed   : > { %3927 = vpow2.f32 %v1625_v46  ;;  %v1711_v29 = vsel %vm422_vm0, %v5063_v56, 0.0  ;;  %vm2013_vm7 = vweird.f32 %v1686_v27 }
 0x2ee   : > { %v2027_v47 = vadd.f32 %v3922_v53, %v2026_v36  ;;  %1712 = vadd.xlane.f32.xlu0 %v1711_v29  ;;  %v2020_v17 = vor.u32 1.1754944e-38, %v2019_v44  ;;  %vm2018_vm9 = vcmp.eq.f32.partialorder %v2017_v25, 8.507059e+37 }
 0x2f0   : > { %v2031_v34 = vsel %vm2030_vm4, %v3922_v53, %v2027_v47  ;;  %v5075_v60 = vpop.xlane.xlu1 %1697 }
 0x2f1   : > { %v2036_v7 = vsel %vm2033_vm5, %v2035_v24, %v2031_v34  ;;  %vm2073_vm4 = vweird.f32 %v5075_v60 }
 0x2f2   : > { %v3926_v57 = vpop.eup %3925  ;;  %v2037_v52 = vmul.f32 %v4797_v21, %v2036_v7  ;;  %3668 = vmatmul.msk.f32.gmra.mxu1 %vm422_vm0, %v3961_v51  ;;  %v3964_v51 = vld [vmem:[%s4194_s19 + $0x68] sm:$0xff] }
 0x2f3   : > { %v5070_v6 = vpop.eup %3927  ;;  %v2009_v38 = vmul.f32 %v3926_v57, %v1686_v27  ;;  %vm2014_vm6 = vweird.f32 %v3926_v57 }
 0x2f4   : > { %3614 = vmatmul.msk.f32.vlgmr.msra.gmra.mxu2 %vm422_vm0, %v2037_v52  ;;  %v1720_v8 = vsel %vm422_vm0, %v5070_v6, 0.0  ;;  %vm2015_vm8 = vmor %vm2013_vm7, %vm2014_vm6 }
 0x2f5   : > { %v2010_v55 = vsub.f32 1.0, %v2009_v38  ;;  %1721 = vadd.xlane.f32.xlu1 %v1720_v8 }
 0x2f7   : > { %v2011_v9 = vmul.f32 %v3926_v57, %v2010_v55  ;;  %v1692_v13 = vpop.xlane.xlu2 %1691 }
 0x2f8   : > { %3929 = vrcp.f32 %v1692_v13  ;;  %v2049_v58 = vand.u32 2147483648, %v1692_v13  ;;  %v2047_v41 = vand.u32 2147483647, %v1692_v13  ;;  %vm2043_vm11 = vweird.f32 %v1692_v13 }
 0x2f9   : > { %v2012_v21 = vadd.f32 %v3926_v57, %v2011_v9  ;;  %3931 = vrcp.f32 %v5075_v60  ;;  %v2079_v9 = vand.u32 2147483648, %v5075_v60 }
 0x2fa   : > { %3669 = vmatmul.msk.f32.gmra.mxu1 %vm422_vm0, %v3962_v42  ;;  %v2050_v1 = vor.u32 1.1754944e-38, %v2049_v58  ;;  %vm2048_vm13 = vcmp.eq.f32.partialorder %v2047_v41, 8.507059e+37  ;;  %v3966_v58 = vld [vmem:[%s4194_s19 + $0x78] sm:$0xff] }
 0x2fb   : > { %v2016_v40 = vsel %vm2015_vm8, %v3926_v57, %v2012_v21 }
 0x2fc   : > { %v2021_v22 = vsel %vm2018_vm9, %v2020_v17, %v2016_v40 }
 0x2fd   : > { %3814 = vrot.lane.b32.xlu2 %v3813_v4, %s4079_s20  ;;  %v2022_v5 = vmul.f32 %v4817_v3, %v2021_v22  ;;  %v2080_v22 = vor.u32 1.1754944e-38, %v2079_v9 }
 0x2fe   : > { %v3930_v43 = vpop.eup %3929  ;;  %v3800_v45 = vpop.permute.xlu0 %3799 }
 0x2ff   : > { %v5084_v18 = vpop.eup %3931  ;;  %v2039_v48 = vmul.f32 %v3930_v43, %v1692_v13  ;;  %v3801_v32 = vunpack.i.l.bf16 %v3800_v45  ;;  %3613 = vmatmul.msk.f32.gmra.mxu3 %vm422_vm0, %v2022_v5  ;;  %v1695_v16 = vpop.xlane.xlu2 %1694  ;;  %v3802_v37 = vunpack.i.h.bf16 %v3800_v45  ;;  %vm2044_vm10 = vweird.f32 %v3930_v43 }
 0x300   : > { %3933 = vrcp.f32 %v1695_v16  ;;  %v2069_v3 = vmul.f32 %v5084_v18, %v5075_v60  ;;  %vm2045_vm12 = vmor %vm2043_vm11, %vm2044_vm10  ;;  %v2064_v47 = vand.u32 2147483648, %v1695_v16  ;;  %v2062_v7 = vand.u32 2147483647, %v1695_v16 }
 0x301   : > { %v2040_v39 = vsub.f32 1.0, %v2039_v48  ;;  %2614 = vmatpush.msra.mxu3 %v3801_v32  ;;  %vm2058_vm15 = vweird.f32 %v1695_v16  ;;  %vm2074_vm1 = vweird.f32 %v5084_v18 }
 0x302   : > { %3819 = vrot.lane.b32.xlu0 %v3818_v11, %s4079_s20  ;;  %v2070_v49 = vsub.f32 1.0, %v2069_v3  ;;  %3670 = vmatmul.msk.f32.gmra.mxu1 %vm422_vm0, %v3963_v23  ;;  %v2065_v38 = vor.u32 1.1754944e-38, %v2064_v47  ;;  %vm2063_vm3 = vcmp.eq.f32.partialorder %v2062_v7, 8.507059e+37  ;;  %vm5109_vm5 = vmor %vm2073_vm4, %vm2074_vm1  ;;  %v2337_v11 = vpop.f32.mrf.mxu3  ;;  %v3968_v23 = vld [vmem:[%s4194_s19 + $0x88] sm:$0xff] }
 0x303   : > { %v2041_v12 = vmul.f32 %v3930_v43, %v2040_v39  ;;  %2615 = vmatpush.msra.mxu3 %v3802_v37 }
 0x304   : > { %v2071_v29 = vmul.f32 %v5084_v18, %v2070_v49 }
 0x305   : > { %v2042_v63 = vadd.f32 %v3930_v43, %v2041_v12 }
 0x306   : > { %v3934_v53 = vpop.eup %3933  ;;  %v3805_v61 = vpop.permute.xlu0 %3804  ;;  %v2072_v8 = vadd.f32 %v5084_v18, %v2071_v29 }
 0x307   : > { %v2054_v33 = vmul.f32 %v3934_v53, %v1695_v16  ;;  %v3806_v54 = vunpack.i.l.bf16 %v3805_v61  ;;  %v1701_v31 = vpop.xlane.xlu2 %1700  ;;  %v3807_v27 = vunpack.i.h.bf16 %v3805_v61  ;;  %v2046_v36 = vsel %vm2045_vm12, %v3930_v43, %v2042_v63 }
 0x308   : > { %3935 = vrcp.f32 %v1701_v31  ;;  %v2051_v24 = vsel %vm2048_vm13, %v2050_v1, %v2046_v36  ;;  %vm2059_vm14 = vweird.f32 %v3934_v53  ;;  %v2094_v62 = vand.u32 2147483648, %v1701_v31  ;;  %v3967_v1 = vld [vmem:[%s4194_s19 + $0x80] sm:$0xff] }
 0x309   : > { %v2055_v46 = vsub.f32 1.0, %v2054_v33  ;;  %2649 = vmatpush.msrb.mxu2 %v3806_v54  ;;  %v2052_v0 = vmul.f32 %v4829_v28, %v2051_v24  ;;  %vm2060_vm2 = vmor %vm2058_vm15, %vm2059_vm14  ;;  %v2077_v28 = vand.u32 2147483647, %v5075_v60  ;;  %v2092_v4 = vand.u32 2147483647, %v1701_v31 }
 0x30a   : > { %3671 = vmatmul.msk.f32.gmra.mxu1 %vm422_vm0, %v3964_v51  ;;  %vm2088_vm8 = vweird.f32 %v1701_v31  ;;  %v2095_v43 = vor.u32 1.1754944e-38, %v2094_v62 }
 0x30b   : > { %v2056_v34 = vmul.f32 %v3934_v53, %v2055_v46  ;;  %2650 = vmatpush.msrb.mxu2 %v3807_v27  ;;  %vm2078_vm7 = vcmp.eq.f32.partialorder %v2077_v28, 8.507059e+37  ;;  %vm2093_vm10 = vcmp.eq.f32.partialorder %v2092_v4, 8.507059e+37  ;;  %v3970_v4 = vld [vmem:[%s4194_s19 + $0x98] sm:$0xff] }
 0x30c   : > { %3615 = vmatmul.msk.f32.gmra.mxu2 %vm422_vm0, %v2052_v0 }
 0x30d   : > { %v2057_v57 = vadd.f32 %v3934_v53, %v2056_v34 }
 0x30e   : > { %v3936_v52 = vpop.eup %3935 }
 0x30f   : > { %v2061_v55 = vsel %vm2060_vm2, %v3934_v53, %v2057_v57  ;;  %v2084_v44 = vmul.f32 %v3936_v52, %v1701_v31  ;;  %vm2089_vm6 = vweird.f32 %v3936_v52 }
 0x310   : > { %v2066_v25 = vsel %vm2063_vm3, %v2065_v38, %v2061_v55  ;;  %vm2090_vm9 = vmor %vm2088_vm8, %vm2089_vm6  ;;  %v3969_v38 = vld [vmem:[%s4194_s19 + $0x90] sm:$0xff] }
 0x311   : > { %v2067_v13 = vmul.f32 %v4842_v35, %v2066_v25  ;;  %v2085_v21 = vsub.f32 1.0, %v2084_v44  ;;  %v2076_v35 = vsel %vm5109_vm5, %v5084_v18, %v2072_v8 }
 0x312   : > { %v2305_v40 = vpop.f32.mrf.mxu2  ;;  %v2081_v45 = vsel %vm2078_vm7, %v2080_v22, %v2076_v35  ;;  %3672 = vmatmul.msk.f32.gmra.mxu1 %vm422_vm0, %v3965_v59  ;;  %vm3089_vm7 = vcmask 261120  }
 0x313   : > { %v2086_v19 = vmul.f32 %v3936_v52, %v2085_v21  ;;  %3616 = vmatmul.msk.f32.vlgmr.msra.gmra.mxu3 %vm422_vm0, %v2067_v13  ;;  %v1704_v60 = vpop.xlane.xlu1 %1703  ;;  %3631 = vmatmul.msk.f32.gmra.mxu0 %vm422_vm0, %v2305_v40  ;;  %v2082_v2 = vmul.f32 %v4823_v14, %v2081_v45 }
 0x314   : > { %3937 = vrcp.f32 %v1704_v60  ;;  %v2109_v3 = vand.u32 2147483648, %v1704_v60  ;;  %vm2103_vm12 = vweird.f32 %v1704_v60 }
 0x315   : > { %v2087_v5 = vadd.f32 %v3936_v52, %v2086_v19 }
 0x316   : > { %v2110_v63 = vor.u32 1.1754944e-38, %v2109_v3 }
 0x317   : > { %v2091_v48 = vsel %vm2090_vm9, %v3936_v52, %v2087_v5 }
 0x318   : > { %v2096_v32 = vsel %vm2093_vm10, %v2095_v43, %v2091_v48 }
 0x319   : > { %v2097_v16 = vmul.f32 %v4862_v20, %v2096_v32  ;;  %v2107_v20 = vand.u32 2147483647, %v1704_v60  ;;  %v3971_v32 = vld [vmem:[%s4194_s19 + $0xa0] sm:$0xff] }
 0x31a   : > { %v3938_v18 = vpop.eup %3937  ;;  %3673 = vmatmul.msk.f32.gmra.mxu1 %vm422_vm0, %v3966_v58  ;;  %v2340_v41 = vpop.f32.mrf.mxu3 }
 0x31b   : > { %v2099_v39 = vmul.f32 %v3938_v18, %v1704_v60  ;;  %3617 = vmatmul.msk.f32.gmra.mxu3 %vm422_vm0, %v2082_v2  ;;  %3618 = vmatmul.msk.f32.vlgmr.msrb.gmra.mxu2 %vm422_vm0, %v2097_v16  ;;  %v1707_v37 = vpop.xlane.xlu1 %1706  ;;  %vm2104_vm11 = vweird.f32 %v3938_v18  ;;  %vm2108_vm14 = vcmp.eq.f32.partialorder %v2107_v20, 8.507059e+37 }
 0x31c   : > { %3632 = vmatmul.msk.f32.gmra.mxu0 %vm422_vm0, %v2337_v11  ;;  %3939 = vrcp.f32 %v1707_v37  ;;  %vm2105_vm13 = vmor %vm2103_vm12, %vm2104_vm11  ;;  %v2124_v7 = vand.u32 2147483648, %v1707_v37  ;;  %vm2118_vm1 = vweird.f32 %v1707_v37  ;;  %v2122_v0 = vand.u32 2147483647, %v1707_v37 }
 0x31d   : > { %v2100_v42 = vsub.f32 1.0, %v2099_v39 }
 0x31e   : > { %v2125_v44 = vor.u32 1.1754944e-38, %v2124_v7  ;;  %vm2123_vm3 = vcmp.eq.f32.partialorder %v2122_v0, 8.507059e+37 }
 0x31f   : > { %v2101_v12 = vmul.f32 %v3938_v18, %v2100_v42  ;;  %v2993_v52 = vpop.f32.mrf.mxu1 }
 0x321   : > { %v2102_v14 = vadd.f32 %v3938_v18, %v2101_v12 }
 0x322   : > { %v3940_v54 = vpop.eup %3939  ;;  %v2372_v31 = vpop.f32.mrf.mxu2  ;;  %3674 = vmatmul.msk.f32.gmra.mxu1 %vm422_vm0, %v3967_v1 }
 0x323   : > { %v2106_v53 = vsel %vm2105_vm13, %v3938_v18, %v2102_v14  ;;  %v1710_v61 = vpop.xlane.xlu1 %1709  ;;  %v2114_v46 = vmul.f32 %v3940_v54, %v1707_v37  ;;  %vm2119_vm15 = vweird.f32 %v3940_v54  ;;  %v2407_v57 = vpop.f32.mrf.mxu3  ;;  %v3972_v14 = vld [vmem:[%s4194_s19 + $0xa8] sm:$0xff] }
 0x324   : > { %3633 = vmatmul.msk.f32.gmra.mxu0 %vm422_vm0, %v2340_v41  ;;  %v2111_v49 = vsel %vm2108_vm14, %v2110_v63, %v2106_v53  ;;  %3941 = vrcp.f32 %v1710_v61  ;;  %vm2120_vm2 = vmor %vm2118_vm1, %vm2119_vm15  ;;  %v2139_v21 = vand.u32 2147483648, %v1710_v61  ;;  %vm2133_vm5 = vweird.f32 %v1710_v61 }
 0x325   : > { %v2112_v33 = vmul.f32 %v4919_v30, %v2111_v49  ;;  %v2115_v27 = vsub.f32 1.0, %v2114_v46  ;;  %v2137_v62 = vand.u32 2147483647, %v1710_v61 }
 0x326   : > { %v2140_v35 = vor.u32 1.1754944e-38, %v2139_v21 }
 0x327   : > { %3619 = vmatmul.msk.f32.gmra.mxu2 %vm422_vm0, %v2112_v33  ;;  %v2116_v29 = vmul.f32 %v3940_v54, %v2115_v27  ;;  %v2996_v22 = vpop.f32.mrf.mxu1  ;;  %vm2138_vm8 = vcmp.eq.f32.partialorder %v2137_v62, 8.507059e+37  ;;  %v3973_v27 = vld [vmem:[%s4194_s19 + $0xb0] sm:$0xff] }
 0x329   : > { %v2117_v24 = vadd.f32 %v3940_v54, %v2116_v29 }
 0x32a   : > { %v3942_v36 = vpop.eup %3941  ;;  %3675 = vmatmul.msk.f32.gmra.mxu1 %vm422_vm0, %v3968_v23  ;;  %v2375_v47 = vpop.f32.mrf.mxu2 }
 0x32b   : > { %v2129_v30 = vmul.f32 %v3942_v36, %v1710_v61  ;;  %v2121_v8 = vsel %vm2120_vm2, %v3940_v54, %v2117_v24  ;;  %vm2134_vm4 = vweird.f32 %v3942_v36  ;;  %v2410_v40 = vpop.f32.mrf.mxu3 }
 0x32c   : > { %3634 = vmatmul.msk.f32.gmra.mxu0 %vm422_vm0, %v2372_v31  ;;  %v2126_v25 = vsel %vm2123_vm3, %v2125_v44, %v2121_v8  ;;  %vm5141_vm6 = vmor %vm2133_vm5, %vm2134_vm4  ;;  %v3974_v8 = vld [vmem:[%s4194_s19 + $0xb8] sm:$0xff] }
 0x32d   : > { %v2130_v34 = vsub.f32 1.0, %v2129_v30  ;;  %v2127_v17 = vmul.f32 %v4954_v10, %v2126_v25 }
 0x32f   : > { %v2131_v55 = vmul.f32 %v3942_v36, %v2130_v34  ;;  %v2999_v18 = vpop.f32.mrf.mxu1 }
 0x331   : > { %v2132_v13 = vadd.f32 %v3942_v36, %v2131_v55 }
 0x332   : > { %3676 = vmatmul.msk.f32.gmra.mxu1 %vm422_vm0, %v3969_v38  ;;  %v2442_v48 = vpop.f32.mrf.mxu2 }
 0x333   : > { %v2136_v60 = vsel %vm5141_vm6, %v3942_v36, %v2132_v13 }
 0x334   : > { %3635 = vmatmul.msk.f32.gmra.mxu0 %vm422_vm0, %v2375_v47  ;;  %v2141_v43 = vsel %vm2138_vm8, %v2140_v35, %v2136_v60 }
 0x335   : > { %v2142_v45 = vmul.f32 %v4975_v15, %v2141_v43 }
 0x337   : > { %v3002_v33 = vpop.f32.mrf.mxu1 }
 0x33a   : > { %3677 = vmatmul.msk.f32.gmra.mxu1 %vm422_vm0, %v3970_v4  ;;  %v2445_v58 = vpop.f32.mrf.mxu2 }
 0x33b   : > { %v3810_v9 = vpop.permute.xlu1 %3809 }
 0x33c   : > { %3636 = vmatmul.msk.f32.gmra.mxu0 %vm422_vm0, %v2407_v57  ;;  %v3811_v28 = vunpack.i.l.bf16 %v3810_v9  ;;  %v3812_v51 = vunpack.i.h.bf16 %v3810_v9 }
 0x33e   : > { %2684 = vmatpush.msrb.mxu3 %v3811_v28 }
 0x33f   : > { %v3005_v38 = vpop.f32.mrf.mxu1 }
 0x340   : > { %2685 = vmatpush.msrb.mxu3 %v3812_v51 }
 0x341   : > { %3620 = vmatmul.msk.f32.vlgmr.msrb.gmra.mxu3 %vm422_vm0, %v2127_v17 }
 0x342   : > { %3678 = vmatmul.msk.f32.gmra.mxu1 %vm422_vm0, %v3971_v32 }
 0x343   : > { %v2880_v10 = vpop.f32.mrf.mxu0 }
 0x344   : > { %v2994_v5 = vadd.f32 %v2993_v52, %v2880_v10  ;;  %3637 = vmatmul.msk.f32.gmra.mxu0 %vm422_vm0, %v2410_v40 }
 0x346   : > { %3090 = vst.msk [vmem:[%s5153_s21] sm:$0xff] %vm3089_vm7, %v2994_v5  ;;  %v3193_v2 = vmul.f32 %v2994_v5, %v2994_v5  ;;  %v3122_v11 = vsel %vm3089_vm7, %v2994_v5, 0.0  ;;  %v3975_v5 = vld [vmem:[%s4194_s19 + $0xc0] sm:$0xff] }
 0x348   : > { %v3225_v42 = vsel %vm3089_vm7, %v3193_v2, 0.0 }
 0x349   : > { %3621 = vmatmul.msk.f32.gmra.mxu3 %vm422_vm0, %v2142_v45  ;;  %v2512_v45 = vpop.f32.mrf.mxu2 }
 0x34a   : > { %3679 = vmatmul.msk.f32.gmra.mxu1 %vm422_vm0, %v3972_v14 }
 0x34b   : > { %v2883_v16 = vpop.f32.mrf.mxu0 }
 0x34c   : > { %v2997_v59 = vadd.f32 %v2996_v22, %v2883_v16  ;;  %3638 = vmatmul.msk.f32.gmra.mxu0 %vm422_vm0, %v2442_v48 }
 0x34e   : > { %3091 = vst.msk [vmem:[%s5153_s21 + $0x8] sm:$0xff] %vm3089_vm7, %v2997_v59  ;;  %v3123_v15 = vsel %vm3089_vm7, %v2997_v59, 0.0  ;;  %v3194_v39 = vmul.f32 %v2997_v59, %v2997_v59 }
 0x34f   : > { %v3124_v37 = vadd.f32 %v3123_v15, %v3122_v11 }
 0x350   : > { %v3226_v3 = vsel %vm3089_vm7, %v3194_v39, 0.0  ;;  %v5169_v12 = vpop.xlane.xlu2 %1715 }
 0x351   : > { %v3227_v20 = vadd.f32 %v3226_v3, %v3225_v42  ;;  %vm2163_vm2 = vweird.f32 %v5169_v12 }
 0x352   : > { %3680 = vmatmul.msk.f32.gmra.mxu1 %vm422_vm0, %v3973_v27 }
 0x353   : > { %v2886_v63 = vpop.f32.mrf.mxu0 }
 0x354   : > { %v3000_v41 = vadd.f32 %v2999_v18, %v2886_v63  ;;  %3639 = vmatmul.msk.f32.gmra.mxu0 %vm422_vm0, %v2445_v58  ;;  %v3008_v63 = vpop.f32.mrf.mxu1 }
 0x356   : > { %3092 = vst.msk [vmem:[%s5153_s21 + $0x10] sm:$0xff] %vm3089_vm7, %v3000_v41  ;;  %v3125_v53 = vsel %vm3089_vm7, %v3000_v41, 0.0  ;;  %v3195_v49 = vmul.f32 %v3000_v41, %v3000_v41  ;;  %v3976_v41 = vld [vmem:[%s4194_s19 + $0xc8] sm:$0xff] }
 0x357   : > { %v3126_v61 = vadd.f32 %v3125_v53, %v3124_v37  ;;  %v2477_v46 = vpop.f32.mrf.mxu3  ;;  %v2169_v53 = vand.u32 2147483648, %v5169_v12 }
 0x358   : > { %v3228_v54 = vsel %vm3089_vm7, %v3195_v49, 0.0  ;;  %v5178_v31 = vpop.xlane.xlu2 %1718 }
 0x359   : > { %v3229_v1 = vadd.f32 %v3228_v54, %v3227_v20  ;;  %3943 = vrcp.f32 %v5178_v31  ;;  %v2184_v11 = vand.u32 2147483648, %v5178_v31  ;;  %vm2178_vm13 = vweird.f32 %v5178_v31 }
 0x35a   : > { %3945 = vrcp.f32 %v5169_v12  ;;  %3681 = vmatmul.msk.f32.gmra.mxu1 %vm422_vm0, %v3974_v8  ;;  %v2182_v37 = vand.u32 2147483647, %v5178_v31 }
 0x35b   : > { %v2889_v36 = vpop.f32.mrf.mxu0  ;;  %v2185_v54 = vor.u32 1.1754944e-38, %v2184_v11 }
 0x35c   : > { %v3003_v23 = vadd.f32 %v3002_v33, %v2889_v36  ;;  %3640 = vmatmul.msk.f32.gmra.mxu0 %vm422_vm0, %v2477_v46  ;;  %v2167_v33 = vand.u32 2147483647, %v5169_v12  ;;  %vm2183_vm4 = vcmp.eq.f32.partialorder %v2182_v37, 8.507059e+37  ;;  %v3982_v37 = vld [vmem:[%s4194_s19 + $0xf8] sm:$0xff] }
 0x35e   : > { %3093 = vst.msk [vmem:[%s5153_s21 + $0x18] sm:$0xff] %vm3089_vm7, %v3003_v23  ;;  %v3127_v29 = vsel %vm3089_vm7, %v3003_v23, 0.0  ;;  %v3196_v30 = vmul.f32 %v3003_v23, %v3003_v23  ;;  %vm2168_vm6 = vcmp.eq.f32.partialorder %v2167_v33, 8.507059e+37 }
 0x35f   : > { %v5188_v47 = vpop.eup %3943  ;;  %v3128_v24 = vadd.f32 %v3127_v29, %v3126_v61  ;;  %v2480_v9 = vpop.f32.mrf.mxu3 }
 0x360   : > { %v3230_v34 = vsel %vm3089_vm7, %v3196_v30, 0.0  ;;  %v3815_v7 = vpop.permute.xlu2 %3814  ;;  %v5193_v55 = vpop.eup %3945  ;;  %v2174_v44 = vmul.f32 %v5188_v47, %v5178_v31  ;;  %vm2179_vm10 = vweird.f32 %v5188_v47 }
 0x361   : > { %v3231_v0 = vadd.f32 %v3230_v34, %v3229_v1  ;;  %v3816_v57 = vunpack.i.l.bf16 %v3815_v7  ;;  %v1713_v52 = vpop.xlane.xlu0 %1712  ;;  %v3817_v25 = vunpack.i.h.bf16 %v3815_v7  ;;  %v2159_v21 = vmul.f32 %v5193_v55, %v5169_v12  ;;  %vm5223_vm15 = vmor %vm2178_vm13, %vm2179_vm10  ;;  %v2515_v31 = vpop.f32.mrf.mxu2 }
 0x362   : > { %3947 = vrcp.f32 %v1713_v52  ;;  %v2175_v51 = vsub.f32 1.0, %v2174_v44  ;;  %3682 = vmatmul.msk.f32.gmra.mxu1 %vm422_vm0, %v3975_v5  ;;  %v2154_v32 = vand.u32 2147483648, %v1713_v52  ;;  %v2152_v59 = vand.u32 2147483647, %v1713_v52 }
 0x363   : > { %v2892_v28 = vpop.f32.mrf.mxu0  ;;  %2719 = vmatpush.msra.mxu2 %v3816_v57  ;;  %v2160_v35 = vsub.f32 1.0, %v2159_v21  ;;  %vm2148_vm11 = vweird.f32 %v1713_v52  ;;  %vm2164_vm12 = vweird.f32 %v5193_v55  ;;  %v2170_v12 = vor.u32 1.1754944e-38, %v2169_v53 }
 0x364   : > { %v3006_v13 = vadd.f32 %v3005_v38, %v2892_v28  ;;  %3641 = vmatmul.msk.f32.gmra.mxu0 %vm422_vm0, %v2480_v9  ;;  %v2176_v43 = vmul.f32 %v5188_v47, %v2175_v51  ;;  %v2155_v42 = vor.u32 1.1754944e-38, %v2154_v32  ;;  %vm2153_vm1 = vcmp.eq.f32.partialorder %v2152_v59, 8.507059e+37  ;;  %vm5239_vm3 = vmor %vm2163_vm2, %vm2164_vm12  ;;  %v3977_v38 = vld [vmem:[%s4194_s19 + $0xd0] sm:$0xff]  ;;  %v3979_v51 = vld [vmem:[%s4194_s19 + $0xe0] sm:$0xff] }
 0x365   : > { %2720 = vmatpush.msra.mxu2 %v3817_v25  ;;  %v2161_v16 = vmul.f32 %v5193_v55, %v2160_v35 }
 0x366   : > { %3094 = vst.msk [vmem:[%s5153_s21 + $0x20] sm:$0xff] %vm3089_vm7, %v3006_v13  ;;  %v3129_v17 = vsel %vm3089_vm7, %v3006_v13, 0.0  ;;  %v3197_v62 = vmul.f32 %v3006_v13, %v3006_v13  ;;  %v2177_v18 = vadd.f32 %v5188_v47, %v2176_v43  ;;  %v3978_v13 = vld [vmem:[%s4194_s19 + $0xd8] sm:$0xff] }
 0x367   : > { %v5203_v19 = vadd.f32 %v3129_v17, %v3128_v24  ;;  %v2162_v3 = vadd.f32 %v5193_v55, %v2161_v16  ;;  %v2547_v8 = vpop.f32.mrf.mxu3 }
 0x368   : > { %v3948_v4 = vpop.eup %3947  ;;  %v3232_v40 = vsel %vm3089_vm7, %v3197_v62, 0.0  ;;  %v5206_v60 = vpop.xlane.xlu1 %1721  ;;  %v2181_v49 = vsel %vm5223_vm15, %v5188_v47, %v2177_v18 }
 0x369   : > { %v2144_v10 = vmul.f32 %v3948_v4, %v1713_v52  ;;  %v5208_v22 = vadd.f32 %v3232_v40, %v3231_v0  ;;  %3949 = vrcp.f32 %v5206_v60  ;;  %vm2149_vm9 = vweird.f32 %v3948_v4  ;;  %v3011_v52 = vpop.f32.mrf.mxu1 }
 0x36a   : > { %vm2150_vm14 = vmor %vm2148_vm11, %vm2149_vm9  ;;  %3683 = vmatmul.msk.f32.gmra.mxu1 %vm422_vm0, %v3976_v41  ;;  %v2186_v23 = vsel %vm2183_vm4, %v2185_v54, %v2181_v49  ;;  %v2199_v24 = vand.u32 2147483648, %v5206_v60  ;;  %vm2193_vm8 = vweird.f32 %v5206_v60  ;;  %v2197_v0 = vand.u32 2147483647, %v5206_v60 }
 0x36b   : > { %v2145_v48 = vsub.f32 1.0, %v2144_v10  ;;  %v2187_v7 = vmul.f32 %v5054_v50, %v2186_v23 }
 0x36c   : > { %3642 = vmatmul.msk.f32.gmra.mxu0 %vm422_vm0, %v2512_v45  ;;  %v2200_v44 = vor.u32 1.1754944e-38, %v2199_v24  ;;  %vm2198_vm10 = vcmp.eq.f32.partialorder %v2197_v0, 8.507059e+37 }
 0x36d   : > { %v2146_v2 = vmul.f32 %v3948_v4, %v2145_v48 }
 0x36f   : > { %v2147_v15 = vadd.f32 %v3948_v4, %v2146_v2  ;;  %v3950_v39 = vpop.eup %3949  ;;  %v3981_v2 = vld [vmem:[%s4194_s19 + $0xf0] sm:$0xff] }
 0x370   : > { %v2189_v58 = vmul.f32 %v3950_v39, %v5206_v60  ;;  %vm2194_vm5 = vweird.f32 %v3950_v39 }
 0x371   : > { %v2151_v14 = vsel %vm2150_vm14, %v3948_v4, %v2147_v15  ;;  %vm2195_vm9 = vmor %vm2193_vm8, %vm2194_vm5  ;;  %v3014_v28 = vpop.f32.mrf.mxu1  ;;  %v3980_v4 = vld [vmem:[%s4194_s19 + $0xe8] sm:$0xff]  ;;  %s5394_s19 = sand.u32 1, %s4069_s28  }
 0x372   : > { %v2156_v61 = vsel %vm2153_vm1, %v2155_v42, %v2151_v14  ;;  %v2190_v46 = vsub.f32 1.0, %v2189_v58  ;;  %3684 = vmatmul.msk.f32.gmra.mxu1 %vm422_vm0, %v3977_v38  ;;  %s329_s12 = scalar_lea.vmem [#allocation2], %s5394_s19  ;;  %s335_s18 = scalar_lea.vmem [#allocation4], %s5394_s19 }
 0x373   : > { %v2157_v1 = vmul.f32 %v5063_v56, %v2156_v61  ;;  %v2166_v56 = vsel %vm5239_vm3, %v5193_v55, %v2162_v3  ;;  %s5405_s13 = sshll.u32 %s329_s12, 4  ;;  %s5410_s20 = sshll.u32 %s335_s18, 4  ;;  %s3320_s13 = int_to_ptr.vmem [resolvable:$true] %s5405_s13  ;;  %s3333_s20 = int_to_ptr.vmem [resolvable:$true] %s5410_s20 }
 0x374   : > { %3643 = vmatmul.msk.f32.gmra.mxu0 %vm422_vm0, %v2515_v31  ;;  %v3820_v36 = vpop.permute.xlu0 %3819  ;;  %v2191_v29 = vmul.f32 %v3950_v39, %v2190_v46  ;;  %v2171_v57 = vsel %vm2168_vm6, %v2170_v12, %v2166_v56  ;;  %s3301_s9 = scalar_lea.sflag [#allocation3], %s5394_s19 }
 0x375   : > { %v3821_v30 = vunpack.i.l.bf16 %v3820_v36  ;;  %3622 = vmatmul.msk.f32.vlgmr.msra.gmra.mxu2 %vm422_vm0, %v2157_v1  ;;  %v3822_v34 = vunpack.i.h.bf16 %v3820_v36  ;;  %v2172_v50 = vmul.f32 %v5042_v26, %v2171_v57 }
 0x376   : > { %v2192_v47 = vadd.f32 %v3950_v39, %v2191_v29 }
 0x377   : > { %2754 = vmatpush.msra.mxu3 %v3821_v30  ;;  %v2582_v17 = vpop.f32.mrf.mxu2 }
 0x378   : > { %v2196_v55 = vsel %vm2195_vm9, %v3950_v39, %v2192_v47 }
 0x379   : > { %2755 = vmatpush.msra.mxu3 %v3822_v34  ;;  %v2201_v9 = vsel %vm2198_vm10, %v2200_v44, %v2196_v55  ;;  %v3017_v26 = vpop.f32.mrf.mxu1 }
 0x37a   : > { %3624 = vmatmul.msk.f32.vlgmr.msra.gmra.mxu3 %vm422_vm0, %v2187_v7  ;;  %v2202_v25 = vmul.f32 %v5070_v6, %v2201_v9  ;;  %3685 = vmatmul.msk.f32.gmra.mxu1 %vm422_vm0, %v3978_v13 }
 0x37c   : > { %3644 = vmatmul.msk.f32.gmra.mxu0 %vm422_vm0, %v2547_v8 }
 0x37d   : > { %3623 = vmatmul.msk.f32.gmra.mxu2 %vm422_vm0, %v2172_v50 }
 0x381   : > { %v3020_v6 = vpop.f32.mrf.mxu1 }
 0x382   : > { %v2550_v21 = vpop.f32.mrf.mxu3  ;;  %3625 = vmatmul.msk.f32.gmra.mxu3 %vm422_vm0, %v2202_v25  ;;  %3686 = vmatmul.msk.f32.gmra.mxu1 %vm422_vm0, %v3979_v51 }
 0x384   : > { %3645 = vmatmul.msk.f32.gmra.mxu0 %vm422_vm0, %v2550_v21 }
 0x389   : > { %v3023_v16 = vpop.f32.mrf.mxu1 }
 0x38a   : > { %3687 = vmatmul.msk.f32.gmra.mxu1 %vm422_vm0, %v3980_v4 }
 0x38c   : > { %3646 = vmatmul.msk.f32.gmra.mxu0 %vm422_vm0, %v2582_v17 }
 0x38f   : > { %v2585_v60 = vpop.f32.mrf.mxu2 }
 0x390   : > { %v2895_v62 = vpop.f32.mrf.mxu0 }
 0x391   : > { %v3009_v40 = vadd.f32 %v3008_v63, %v2895_v62  ;;  %v3026_v20 = vpop.f32.mrf.mxu1 }
 0x392   : > { %3688 = vmatmul.msk.f32.gmra.mxu1 %vm422_vm0, %v3981_v2 }
 0x393   : > { %3095 = vst.msk [vmem:[%s5153_s21 + $0x28] sm:$0xff] %vm3089_vm7, %v3009_v40  ;;  %v3131_v35 = vsel %vm3089_vm7, %v3009_v40, 0.0  ;;  %v3198_v10 = vmul.f32 %v3009_v40, %v3009_v40 }
 0x394   : > { %3647 = vmatmul.msk.f32.gmra.mxu0 %vm422_vm0, %v2585_v60  ;;  %v3132_v5 = vadd.f32 %v3131_v35, %v5203_v19 }
 0x395   : > { %v3234_v43 = vsel %vm3089_vm7, %v3198_v10, 0.0 }
 0x396   : > { %v3235_v45 = vadd.f32 %v3234_v43, %v5208_v22  ;;  %v2617_v48 = vpop.f32.mrf.mxu3 }
 0x399   : > { %v2898_v32 = vpop.f32.mrf.mxu0  ;;  %v3029_v46 = vpop.f32.mrf.mxu1 }
 0x39a   : > { %v3012_v59 = vadd.f32 %v3011_v52, %v2898_v32  ;;  %3689 = vmatmul.msk.f32.gmra.mxu1 %vm422_vm0, %v3982_v37 }
 0x39c   : > { %3096 = vst.msk [vmem:[%s5153_s21 + $0x30] sm:$0xff] %vm3089_vm7, %v3012_v59  ;;  %v3133_v18 = vsel %vm3089_vm7, %v3012_v59, 0.0  ;;  %v3199_v11 = vmul.f32 %v3012_v59, %v3012_v59  ;;  %3648 = vmatmul.msk.f32.gmra.mxu0 %vm422_vm0, %v2617_v48 }
 0x39d   : > { %v3134_v19 = vadd.f32 %v3133_v18, %v3132_v5 }
 0x39e   : > { %v3236_v15 = vsel %vm3089_vm7, %v3199_v11, 0.0  ;;  %v2620_v3 = vpop.f32.mrf.mxu3  ;;  %v2652_v33 = vpop.f32.mrf.mxu2 }
 0x39f   : > { %v3237_v39 = vadd.f32 %v3236_v15, %v3235_v45 }
 0x3a1   : > { %v2901_v22 = vpop.f32.mrf.mxu0  ;;  %v3032_v7 = vpop.f32.mrf.mxu1 }
 0x3a2   : > { %v3015_v42 = vadd.f32 %v3014_v28, %v2901_v22 }
 0x3a4   : > { %3097 = vst.msk [vmem:[%s5153_s21 + $0x38] sm:$0xff] %vm3089_vm7, %v3015_v42  ;;  %v3135_v14 = vsel %vm3089_vm7, %v3015_v42, 0.0  ;;  %v3200_v58 = vmul.f32 %v3015_v42, %v3015_v42  ;;  %3649 = vmatmul.msk.f32.gmra.mxu0 %vm422_vm0, %v2620_v3 }
 0x3a5   : > { %v3136_v63 = vadd.f32 %v3135_v14, %v3134_v19 }
 0x3a6   : > { %v3238_v41 = vsel %vm3089_vm7, %v3200_v58, 0.0 }
 0x3a7   : > { %v3239_v53 = vadd.f32 %v3238_v41, %v3237_v39 }
 0x3a9   : > { %v2904_v49 = vpop.f32.mrf.mxu0  ;;  %v3035_v9 = vpop.f32.mrf.mxu1 }
 0x3aa   : > { %v3018_v61 = vadd.f32 %v3017_v26, %v2904_v49  ;;  %v2655_v30 = vpop.f32.mrf.mxu2 }
 0x3ac   : > { %3098 = vst.msk [vmem:[%s5153_s21 + $0x40] sm:$0xff] %vm3089_vm7, %v3018_v61  ;;  %v3137_v54 = vsel %vm3089_vm7, %v3018_v61, 0.0  ;;  %v3201_v31 = vmul.f32 %v3018_v61, %v3018_v61  ;;  %3650 = vmatmul.msk.f32.gmra.mxu0 %vm422_vm0, %v2652_v33 }
 0x3ad   : > { %v3138_v1 = vadd.f32 %v3137_v54, %v3136_v63 }
 0x3ae   : > { %v3240_v27 = vsel %vm3089_vm7, %v3201_v31, 0.0 }
 0x3af   : > { %v3241_v36 = vadd.f32 %v3240_v27, %v3239_v53 }
 0x3b1   : > { %v2907_v23 = vpop.f32.mrf.mxu0  ;;  %v3038_v4 = vpop.f32.mrf.mxu1 }
 0x3b2   : > { %v3021_v29 = vadd.f32 %v3020_v6, %v2907_v23 }
 0x3b4   : > { %3099 = vst.msk [vmem:[%s5153_s21 + $0x48] sm:$0xff] %vm3089_vm7, %v3021_v29  ;;  %v3139_v56 = vsel %vm3089_vm7, %v3021_v29, 0.0  ;;  %v3202_v12 = vmul.f32 %v3021_v29, %v3021_v29  ;;  %3651 = vmatmul.msk.f32.gmra.mxu0 %vm422_vm0, %v2655_v30 }
 0x3b5   : > { %v3140_v47 = vadd.f32 %v3139_v56, %v3138_v1 }
 0x3b6   : > { %v3242_v24 = vsel %vm3089_vm7, %v3202_v12, 0.0 }
 0x3b7   : > { %v3243_v34 = vadd.f32 %v3242_v24, %v3241_v36 }
 0x3b9   : > { %v2910_v0 = vpop.f32.mrf.mxu0  ;;  %v3041_v59 = vpop.f32.mrf.mxu1 }
 0x3ba   : > { %v3024_v57 = vadd.f32 %v3023_v16, %v2910_v0 }
 0x3bc   : > { %3100 = vst.msk [vmem:[%s5153_s21 + $0x50] sm:$0xff] %vm3089_vm7, %v3024_v57  ;;  %v3141_v52 = vsel %vm3089_vm7, %v3024_v57, 0.0  ;;  %v3203_v38 = vmul.f32 %v3024_v57, %v3024_v57 }
 0x3bd   : > { %v3142_v8 = vadd.f32 %v3141_v52, %v3140_v47 }
 0x3be   : > { %v3244_v55 = vsel %vm3089_vm7, %v3203_v38, 0.0 }
 0x3bf   : > { %v3245_v44 = vadd.f32 %v3244_v55, %v3243_v34 }
 0x3c1   : > { %v2913_v50 = vpop.f32.mrf.mxu0 }
 0x3c2   : > { %v3027_v25 = vadd.f32 %v3026_v20, %v2913_v50  ;;  %v3044_v20 = vpop.f32.mrf.mxu1 }
 0x3c4   : > { %3101 = vst.msk [vmem:[%s5153_s21 + $0x58] sm:$0xff] %vm3089_vm7, %v3027_v25  ;;  %v3143_v28 = vsel %vm3089_vm7, %v3027_v25, 0.0  ;;  %v3204_v13 = vmul.f32 %v3027_v25, %v3027_v25  ;;  %v2687_v26 = vpop.f32.mrf.mxu3 }
 0x3c5   : > { %v3144_v21 = vadd.f32 %v3143_v28, %v3142_v8  ;;  %3652 = vmatmul.msk.f32.gmra.mxu0 %vm422_vm0, %v2687_v26 }
 0x3c6   : > { %v3246_v51 = vsel %vm3089_vm7, %v3204_v13, 0.0 }
 0x3c7   : > { %v3247_v17 = vadd.f32 %v3246_v51, %v3245_v44 }
 0x3c9   : > { %v2916_v62 = vpop.f32.mrf.mxu0 }
 0x3ca   : > { %v3030_v6 = vadd.f32 %v3029_v46, %v2916_v62  ;;  %v3047_v54 = vpop.f32.mrf.mxu1 }
 0x3cc   : > { %3102 = vst.msk [vmem:[%s5153_s21 + $0x60] sm:$0xff] %vm3089_vm7, %v3030_v6  ;;  %v3145_v40 = vsel %vm3089_vm7, %v3030_v6, 0.0  ;;  %v3205_v60 = vmul.f32 %v3030_v6, %v3030_v6  ;;  %v2690_v10 = vpop.f32.mrf.mxu3 }
 0x3cd   : > { %v3146_v35 = vadd.f32 %v3145_v40, %v3144_v21  ;;  %3653 = vmatmul.msk.f32.gmra.mxu0 %vm422_vm0, %v2690_v10 }
 0x3ce   : > { %v3248_v5 = vsel %vm3089_vm7, %v3205_v60, 0.0 }
 0x3cf   : > { %v3249_v43 = vadd.f32 %v3248_v5, %v3247_v17 }
 0x3d1   : > { %v2919_v45 = vpop.f32.mrf.mxu0 }
 0x3d2   : > { %v3033_v48 = vadd.f32 %v3032_v7, %v2919_v45  ;;  %v3050_v56 = vpop.f32.mrf.mxu1 }
 0x3d4   : > { %3103 = vst.msk [vmem:[%s5153_s21 + $0x68] sm:$0xff] %vm3089_vm7, %v3033_v48  ;;  %v3147_v32 = vsel %vm3089_vm7, %v3033_v48, 0.0  ;;  %v3206_v16 = vmul.f32 %v3033_v48, %v3033_v48 }
 0x3d5   : > { %v3148_v2 = vadd.f32 %v3147_v32, %v3146_v35 }
 0x3d6   : > { %v3250_v18 = vsel %vm3089_vm7, %v3206_v16, 0.0 }
 0x3d7   : > { %v3251_v11 = vadd.f32 %v3250_v18, %v3249_v43 }
 0x3d9   : > { %v2922_v19 = vpop.f32.mrf.mxu0 }
 0x3da   : > { %v3036_v15 = vadd.f32 %v3035_v9, %v2922_v19  ;;  %v3053_v44 = vpop.f32.mrf.mxu1 }
 0x3dc   : > { %3104 = vst.msk [vmem:[%s5153_s21 + $0x70] sm:$0xff] %vm3089_vm7, %v3036_v15  ;;  %v3149_v39 = vsel %vm3089_vm7, %v3036_v15, 0.0  ;;  %v3207_v22 = vmul.f32 %v3036_v15, %v3036_v15 }
 0x3dd   : > { %v3150_v37 = vadd.f32 %v3149_v39, %v3148_v2 }
 0x3de   : > { %v3252_v42 = vsel %vm3089_vm7, %v3207_v22, 0.0 }
 0x3df   : > { %v3253_v3 = vadd.f32 %v3252_v42, %v3251_v11 }
 0x3e1   : > { %v2925_v14 = vpop.f32.mrf.mxu0 }
 0x3e2   : > { %v3039_v58 = vadd.f32 %v3038_v4, %v2925_v14  ;;  %v3056_v4 = vpop.f32.mrf.mxu1 }
 0x3e4   : > { %3105 = vst.msk [vmem:[%s5153_s21 + $0x78] sm:$0xff] %vm3089_vm7, %v3039_v58  ;;  %v3151_v63 = vsel %vm3089_vm7, %v3039_v58, 0.0  ;;  %v3208_v41 = vmul.f32 %v3039_v58, %v3039_v58 }
 0x3e5   : > { %v3152_v53 = vadd.f32 %v3151_v63, %v3150_v37 }
 0x3e6   : > { %v3254_v49 = vsel %vm3089_vm7, %v3208_v41, 0.0 }
 0x3e7   : > { %v3255_v61 = vadd.f32 %v3254_v49, %v3253_v3 }
 0x3e9   : > { %v2928_v33 = vpop.f32.mrf.mxu0 }
 0x3ea   : > { %v3042_v31 = vadd.f32 %v3041_v59, %v2928_v33  ;;  %v3059_v16 = vpop.f32.mrf.mxu1 }
 0x3ec   : > { %3106 = vst.msk [vmem:[%s5153_s21 + $0x80] sm:$0xff] %vm3089_vm7, %v3042_v31  ;;  %v3153_v1 = vsel %vm3089_vm7, %v3042_v31, 0.0  ;;  %v3209_v46 = vmul.f32 %v3042_v31, %v3042_v31 }
 0x3ed   : > { %v3154_v27 = vadd.f32 %v3153_v1, %v3152_v53 }
 0x3ee   : > { %v3256_v36 = vsel %vm3089_vm7, %v3209_v46, 0.0 }
 0x3ef   : > { %v3257_v23 = vadd.f32 %v3256_v36, %v3255_v61 }
 0x3f1   : > { %v2931_v29 = vpop.f32.mrf.mxu0 }
 0x3f2   : > { %v3045_v30 = vadd.f32 %v3044_v20, %v2931_v29  ;;  %v3062_v37 = vpop.f32.mrf.mxu1 }
 0x3f4   : > { %3107 = vst.msk [vmem:[%s5153_s21 + $0x88] sm:$0xff] %vm3089_vm7, %v3045_v30  ;;  %v3155_v12 = vsel %vm3089_vm7, %v3045_v30, 0.0  ;;  %v3210_v47 = vmul.f32 %v3045_v30, %v3045_v30 }
 0x3f5   : > { %v3156_v24 = vadd.f32 %v3155_v12, %v3154_v27 }
 0x3f6   : > { %v3258_v34 = vsel %vm3089_vm7, %v3210_v47, 0.0 }
 0x3f7   : > { %v3259_v7 = vadd.f32 %v3258_v34, %v3257_v23 }
 0x3f8   : > { %v2722_v0 = vpop.f32.mrf.mxu2 }
 0x3f9   : > { %v2934_v57 = vpop.f32.mrf.mxu0  ;;  %3654 = vmatmul.msk.f32.gmra.mxu0 %vm422_vm0, %v2722_v0 }
 0x3fa   : > { %v3048_v52 = vadd.f32 %v3047_v54, %v2934_v57  ;;  %v3065_v33 = vpop.f32.mrf.mxu1 }
 0x3fc   : > { %3108 = vst.msk [vmem:[%s5153_s21 + $0x90] sm:$0xff] %vm3089_vm7, %v3048_v52  ;;  %v3157_v38 = vsel %vm3089_vm7, %v3048_v52, 0.0  ;;  %v3211_v8 = vmul.f32 %v3048_v52, %v3048_v52 }
 0x3fd   : > { %v3158_v55 = vadd.f32 %v3157_v38, %v3156_v24  ;;  %v2757_v17 = vpop.f32.mrf.mxu3 }
 0x3fe   : > { %v3260_v50 = vsel %vm3089_vm7, %v3211_v8, 0.0 }
 0x3ff   : > { %v3261_v9 = vadd.f32 %v3260_v50, %v3259_v7 }
 0x400   : > { %v2725_v25 = vpop.f32.mrf.mxu2 }
 0x401   : > { %v2937_v28 = vpop.f32.mrf.mxu0  ;;  %3655 = vmatmul.msk.f32.gmra.mxu0 %vm422_vm0, %v2725_v25 }
 0x402   : > { %v3051_v13 = vadd.f32 %v3050_v56, %v2937_v28  ;;  %v3068_v56 = vpop.f32.mrf.mxu1 }
 0x404   : > { %3109 = vst.msk [vmem:[%s5153_s21 + $0x98] sm:$0xff] %vm3089_vm7, %v3051_v13  ;;  %v3159_v21 = vsel %vm3089_vm7, %v3051_v13, 0.0  ;;  %v3212_v26 = vmul.f32 %v3051_v13, %v3051_v13 }
 0x405   : > { %v3160_v51 = vadd.f32 %v3159_v21, %v3158_v55  ;;  %v2760_v48 = vpop.f32.mrf.mxu3 }
 0x406   : > { %v3262_v62 = vsel %vm3089_vm7, %v3212_v26, 0.0 }
 0x407   : > { %v3263_v6 = vadd.f32 %v3262_v62, %v3261_v9 }
 0x409   : > { %v2940_v40 = vpop.f32.mrf.mxu0  ;;  %3656 = vmatmul.msk.f32.gmra.mxu0 %vm422_vm0, %v2757_v17 }
 0x40a   : > { %v3054_v60 = vadd.f32 %v3053_v44, %v2940_v40  ;;  %v3071_v52 = vpop.f32.mrf.mxu1 }
 0x40c   : > { %3110 = vst.msk [vmem:[%s5153_s21 + $0xa0] sm:$0xff] %vm3089_vm7, %v3054_v60  ;;  %v3161_v35 = vsel %vm3089_vm7, %v3054_v60, 0.0  ;;  %v3213_v10 = vmul.f32 %v3054_v60, %v3054_v60 }
 0x40d   : > { %v3162_v5 = vadd.f32 %v3161_v35, %v3160_v51 }
 0x40e   : > { %v3264_v43 = vsel %vm3089_vm7, %v3213_v10, 0.0 }
 0x40f   : > { %v3265_v45 = vadd.f32 %v3264_v43, %v3263_v6 }
 0x411   : > { %v2943_v32 = vpop.f32.mrf.mxu0  ;;  %3657 = vmatmul.msk.f32.gmra.mxu0 %vm422_vm0, %v2760_v48  ;;  %vm3191_vm0 = vcmask 253952  }
 0x412   : > { %v3057_v2 = vadd.f32 %v3056_v4, %v2943_v32  ;;  %v3074_v28 = vpop.f32.mrf.mxu1 }
 0x414   : > { %3111 = vst.msk [vmem:[%s5153_s21 + $0xa8] sm:$0xff] %vm3089_vm7, %v3057_v2  ;;  %v3163_v59 = vsel %vm3089_vm7, %v3057_v2, 0.0  ;;  %v3214_v18 = vmul.f32 %v3057_v2, %v3057_v2 }
 0x415   : > { %v3164_v11 = vadd.f32 %v3163_v59, %v3162_v5 }
 0x416   : > { %v3266_v19 = vsel %vm3089_vm7, %v3214_v18, 0.0 }
 0x417   : > { %v3267_v15 = vadd.f32 %v3266_v19, %v3265_v45 }
 0x419   : > { %v2946_v39 = vpop.f32.mrf.mxu0 }
 0x41a   : > { %v3060_v22 = vadd.f32 %v3059_v16, %v2946_v39  ;;  %v3077_v26 = vpop.f32.mrf.mxu1 }
 0x41c   : > { %3112 = vst.msk [vmem:[%s5153_s21 + $0xb0] sm:$0xff] %vm3089_vm7, %v3060_v22  ;;  %v3165_v42 = vsel %vm3089_vm7, %v3060_v22, 0.0  ;;  %v3215_v3 = vmul.f32 %v3060_v22, %v3060_v22 }
 0x41d   : > { %v3166_v20 = vadd.f32 %v3165_v42, %v3164_v11 }
 0x41e   : > { %v3268_v14 = vsel %vm3089_vm7, %v3215_v3, 0.0 }
 0x41f   : > { %v3269_v58 = vadd.f32 %v3268_v14, %v3267_v15 }
 0x421   : > { %v2949_v63 = vpop.f32.mrf.mxu0 }
 0x422   : > { %v3063_v41 = vadd.f32 %v3062_v37, %v2949_v63  ;;  %v3080_v62 = vpop.f32.mrf.mxu1 }
 0x424   : > { %3113 = vst.msk [vmem:[%s5153_s21 + $0xb8] sm:$0xff] %vm3089_vm7, %v3063_v41  ;;  %v3167_v53 = vsel %vm3089_vm7, %v3063_v41, 0.0  ;;  %v3216_v49 = vmul.f32 %v3063_v41, %v3063_v41 }
 0x425   : > { %v3168_v61 = vadd.f32 %v3167_v53, %v3166_v20 }
 0x426   : > { %v3270_v54 = vsel %vm3089_vm7, %v3216_v49, 0.0 }
 0x427   : > { %v3271_v31 = vadd.f32 %v3270_v54, %v3269_v58 }
 0x429   : > { %v2952_v1 = vpop.f32.mrf.mxu0 }
 0x42a   : > { %v3066_v46 = vadd.f32 %v3065_v33, %v2952_v1  ;;  %v3083_v40 = vpop.f32.mrf.mxu1 }
 0x42c   : > { %3114 = vst.msk [vmem:[%s5153_s21 + $0xc0] sm:$0xff] %vm3089_vm7, %v3066_v46  ;;  %v3169_v27 = vsel %vm3089_vm7, %v3066_v46, 0.0  ;;  %v3217_v36 = vmul.f32 %v3066_v46, %v3066_v46 }
 0x42d   : > { %v3170_v23 = vadd.f32 %v3169_v27, %v3168_v61 }
 0x42e   : > { %v3272_v29 = vsel %vm3089_vm7, %v3217_v36, 0.0 }
 0x42f   : > { %v3273_v30 = vadd.f32 %v3272_v29, %v3271_v31 }
 0x431   : > { %v2955_v12 = vpop.f32.mrf.mxu0 }
 0x432   : > { %v3069_v47 = vadd.f32 %v3068_v56, %v2955_v12  ;;  %v3086_v15 = vpop.f32.mrf.mxu1 }
 0x434   : > { %3115 = vst.msk [vmem:[%s5153_s21 + $0xc8] sm:$0xff] %vm3089_vm7, %v3069_v47  ;;  %v3171_v24 = vsel %vm3089_vm7, %v3069_v47, 0.0  ;;  %v3218_v34 = vmul.f32 %v3069_v47, %v3069_v47 }
 0x435   : > { %v3172_v7 = vadd.f32 %v3171_v24, %v3170_v23 }
 0x436   : > { %v3274_v0 = vsel %vm3089_vm7, %v3218_v34, 0.0 }
 0x437   : > { %v3275_v57 = vadd.f32 %v3274_v0, %v3273_v30 }
 0x442   : > { %v2958_v38 = vpop.f32.mrf.mxu0 }
 0x443   : > { %v3072_v8 = vadd.f32 %v3071_v52, %v2958_v38 }
 0x445   : > { %3116 = vst.msk [vmem:[%s5153_s21 + $0xd0] sm:$0xff] %vm3089_vm7, %v3072_v8  ;;  %v3173_v55 = vsel %vm3089_vm7, %v3072_v8, 0.0  ;;  %v3219_v44 = vmul.f32 %v3072_v8, %v3072_v8 }
 0x446   : > { %v3174_v50 = vadd.f32 %v3173_v55, %v3172_v7 }
 0x447   : > { %v3276_v9 = vsel %vm3089_vm7, %v3219_v44, 0.0 }
 0x448   : > { %v3277_v25 = vadd.f32 %v3276_v9, %v3275_v57 }
 0x44a   : > { %v2961_v13 = vpop.f32.mrf.mxu0 }
 0x44b   : > { %v3075_v21 = vadd.f32 %v3074_v28, %v2961_v13 }
 0x44d   : > { %3117 = vst.msk [vmem:[%s5153_s21 + $0xd8] sm:$0xff] %vm3089_vm7, %v3075_v21  ;;  %v3220_v60 = vmul.f32 %v3075_v21, %v3075_v21  ;;  %v3175_v10 = vsel %vm3089_vm7, %v3075_v21, 0.0 }
 0x44e   : > { %v3176_v16 = vadd.f32 %v3175_v10, %v3174_v50 }
 0x44f   : > { %v3278_v45 = vsel %vm3089_vm7, %v3220_v60, 0.0 }
 0x450   : > { %v3279_v11 = vadd.f32 %v3278_v45, %v3277_v25 }
 0x476   : > { %v2964_v51 = vpop.f32.mrf.mxu0 }
 0x477   : > { %v3078_v17 = vadd.f32 %v3077_v26, %v2964_v51 }
 0x479   : > { %3118 = vst.msk [vmem:[%s5153_s21 + $0xe0] sm:$0xff] %vm3089_vm7, %v3078_v17  ;;  %v3221_v5 = vmul.f32 %v3078_v17, %v3078_v17  ;;  %v3177_v48 = vsel %vm3089_vm7, %v3078_v17, 0.0 }
 0x47a   : > { %v3178_v19 = vadd.f32 %v3177_v48, %v3176_v16 }
 0x47b   : > { %v3280_v2 = vsel %vm3089_vm7, %v3221_v5, 0.0 }
 0x47c   : > { %v3281_v37 = vadd.f32 %v3280_v2, %v3279_v11 }
 0x47e   : > { %v2967_v6 = vpop.f32.mrf.mxu0 }
 0x47f   : > { %v3081_v4 = vadd.f32 %v3080_v62, %v2967_v6 }
 0x481   : > { %3119 = vst.msk [vmem:[%s5153_s21 + $0xe8] sm:$0xff] %vm3089_vm7, %v3081_v4  ;;  %v3222_v32 = vmul.f32 %v3081_v4, %v3081_v4  ;;  %v3179_v59 = vsel %vm3089_vm7, %v3081_v4, 0.0 }
 0x482   : > { %v3180_v42 = vadd.f32 %v3179_v59, %v3178_v19 }
 0x483   : > { %v3282_v39 = vsel %vm3089_vm7, %v3222_v32, 0.0 }
 0x484   : > { %v3283_v58 = vadd.f32 %v3282_v39, %v3281_v37 }
 0x486   : > { %v2970_v35 = vpop.f32.mrf.mxu0 }
 0x487   : > { %v3084_v43 = vadd.f32 %v3083_v40, %v2970_v35 }
 0x489   : > { %3120 = vst.msk [vmem:[%s5153_s21 + $0xf0] sm:$0xff] %vm3089_vm7, %v3084_v43  ;;  %v3223_v18 = vmul.f32 %v3084_v43, %v3084_v43  ;;  %v3181_v22 = vsel %vm3089_vm7, %v3084_v43, 0.0 }
 0x48a   : > { %v3182_v63 = vadd.f32 %v3181_v22, %v3180_v42 }
 0x48b   : > { %v3284_v20 = vsel %vm3089_vm7, %v3223_v18, 0.0 }
 0x48c   : > { %v3285_v49 = vadd.f32 %v3284_v20, %v3283_v58 }
 0x48e   : > { %v2973_v3 = vpop.f32.mrf.mxu0 }
 0x48f   : > { %v3087_v14 = vadd.f32 %v3086_v15, %v2973_v3 }
 0x491   : > { %3121 = vst.msk [vmem:[%s5153_s21 + $0xf8] sm:$0xff] %vm3089_vm7, %v3087_v14  ;;  %v3183_v41 = vsel %vm3089_vm7, %v3087_v14, 0.0  ;;  %v3224_v53 = vmul.f32 %v3087_v14, %v3087_v14  ;;  %s5412_s21 = sshll.u32 %s3330_s10, 4  ;;  %s3335_s21 = int_to_ptr.hbm [resolvable:$true] %s5412_s21 }
 0x492   : > { %v3184_v61 = vadd.f32 %v3183_v41, %v3182_v63 }
 0x493   : > { %v3286_v33 = vsel %vm3089_vm7, %v3224_v53, 0.0 }
 0x494   : > { %v3185_v54 = vrot.slane %v3184_v61, 4  ;;  %v3287_v31 = vadd.f32 %v3286_v33, %v3285_v49 }
 0x496   : > { %v3186_v1 = vadd.f32 %v3185_v54, %v3184_v61  ;;  %v3288_v46 = vrot.slane %v3287_v31, 4 }
 0x498   : > { %v3187_v27 = vrot.slane %v3186_v1, 2  ;;  %v3289_v36 = vadd.f32 %v3288_v46, %v3287_v31 }
 0x49a   : > { %v3188_v23 = vadd.f32 %v3187_v27, %v3186_v1  ;;  %v3290_v29 = vrot.slane %v3289_v36, 2 }
 0x49c   : > { %v3189_v30 = vrot.slane %v3188_v23, 1  ;;  %v3291_v56 = vadd.f32 %v3290_v29, %v3289_v36 }
 0x49e   : > { %v3190_v12 = vadd.f32 %v3189_v30, %v3188_v23  ;;  %v3292_v47 = vrot.slane %v3291_v56, 1 }
 0x4a0   : > { %3192 = vst.msk [vmem:[%s329_s12] sm:$0x1] %vm3191_vm0, %v3190_v12  ;;  %v3293_v24 = vadd.f32 %v3292_v47, %v3291_v56 }
 0x4a1   : > { %4010 = shalt.err (!%p4007_p4)
}
 0x4a2   : > { %3698 = dma.vmem_to_hbm [thread:$0]  (%p4163_p5), %s3320_s13, 16, %s3322_s17, %s3301_s9   ;;  %3294 = vst.msk [vmem:[%s335_s18] sm:$0x1] %vm3191_vm0, %v3293_v24 }
 0x4a3   : > { %s3305_s12 = scalar_lea.sflag [#allocation5], %s5394_s19  ;;  %s4025_s24 = sshra.s32 %s3335_s21, 4  ;;  %s4026_s24 = int_to_ptr.hbm [resolvable:$true] %s4025_s24 }
 0x4a4   : > { %s4027_s25 = scalar_lea.hbm %s4026_s24, 1  ;;  %s4031_s23 = scalar_lea.hbm %s5473_s8, 2 }
 0x4a5   : > { %p4028_p7 = scmp.ne.s32.totalorder %s4026_s24, %s4027_s25  ;;  %p4032_p10 = scmp.lt.s32.totalorder %s4026_s24, %s5473_s8 }
 0x4a6   : > { %p4033_p11 = scmp.lt.s32.totalorder %s4031_s23, %s4027_s25 }
 0x4a7   : > { %p4029_p8 = pnand %p4028_p7, %p4163_p5 }
 0x4a8   : > { %p4034_p12 = por %p4033_p11, %p4032_p10 }
 0x4a9   : > { %p4030_p9 = pneg %p4029_p8 }
 0x4ab   : > { %p4035_p13 = pnand %p4034_p12, %p4030_p9 }
 0x4ad   : > { %4038 = shalt.err (!%p4035_p13)
}
 0x4ae   : > { %3699 = dma.vmem_to_hbm [thread:$0]  (%p4163_p5), %s3333_s20, 16, %s3335_s21, %s3305_s12  }
 0x4af PF: > { %p3709_p0 = scmp.ge.s32.totalorder %s4077_s30, 2  ;;  %s3354_s19 = sand.u32 1, %s4065_s27  }
 0x4b0   : > { %s3355_s13 = scalar_lea.sflag [#allocation3], %s3354_s19 }
 0x4b1   : > { %p3703_p1 = pnand %p3709_p0, %p4167_p6 }
 0x4b3   : > { %p3704_p2 = pneg %p3703_p1 }
 0x4b5   : > { %4056 = dma.done.wait (%p3704_p2), %s3355_s13, 16  }
 0x4b6   : > { %4058 = vsyncadd (%p3704_p2), %s3355_s13, 4294967280  ;;  %s3364_s17 = scalar_lea.sflag [#allocation5], %s3354_s19 }
 0x4b7   : > { %4060 = dma.done.wait (%p3704_p2), %s3364_s17, 16  }
 0x4b8   : > { %4062 = vsyncadd (%p3704_p2), %s3364_s17, 4294967280  ;;  %p22_p5 = scmp.ge.s32.totalorder %s4150_s11, 4   ;;  %s5510_s27 = smov %s4069_s28 }
 0x4b9   : > { %s5511_s28 = smov %s4073_s29  ;;  %s5512_s29 = smov %s4161_s14 }
 0x4ba   : > { %s5513_s30 = smov %s4150_s11  ;;  %24 = sbr.rel (!%p22_p5) target bundleno = 7 (0x7), region = 111 }
 0x4bf   :  { %3369 = vsyncpa [#allocation3], 1 }
 0x4c0   :  { %3371 = vsyncpa [#allocation3 + $0x1], 1 }
 0x4c1   :  { %3372 = vsyncpa [#allocation5], 1 }
 0x4c2   :  { %3374 = vsyncpa [#allocation5 + $0x1], 1 }

</bundles_post_ra>
